<compile_context>
chip_gen: v7x
topology: tpu7x:2x2x1
jax: 0.10.0
libtpu: 0.0.40
codegen_flags: <defaults>
</compile_context>

<pallas_src>
import jax
import jax.numpy as jnp
from jax.experimental import pallas as pl
from jax.experimental.pallas import tpu as pltpu


def _dwconv_kernel(x_ref, w_ref, b_ref, o_ref):
    # x_ref : (1, H, W, Ct)  input tile (one batch element, one channel slab)
    # w_ref : (3, 3, Ct)     depthwise weights for this channel slab
    # b_ref : (1, Ct)        bias for this channel slab
    # o_ref : (1, H, W, Ct)  output tile
    _, H, W, Ct = o_ref.shape

    wv = w_ref[...].astype(jnp.float32)                       # (3, 3, Ct)
    wk = [[wv[i, j] for j in range(3)] for i in range(3)]     # 9 x (Ct,) hoisted taps
    bv = b_ref[0].astype(jnp.float32)                         # (Ct,)

    # Row-strip size: keep (strip block rows + accumulator + one column-sum) within the
    # vreg file.  cw = vregs per row of the tile.
    cw = ((W + 7) // 8) * ((Ct + 127) // 128)
    hs = max(1, min(H, 16, 12 // max(1, cw)))

    for r0 in range(0, H, hs):
        rows = min(hs, H - r0)

        # Rows [r0-1, r0+rows+1) of the image, zero-filled outside [0, H).
        lo, hi = r0 - 1, r0 + rows + 1
        pieces = []
        if lo < 0:
            pieces.append(jnp.zeros((-lo, W, Ct), jnp.float32))
        pieces.append(x_ref[0, max(lo, 0):min(hi, H), :, :].astype(jnp.float32))
        if hi > H:
            pieces.append(jnp.zeros((hi - H, W, Ct), jnp.float32))
        block = pieces[0] if len(pieces) == 1 else jnp.concatenate(pieces, axis=0)

        p0 = block[0:rows]           # image rows r-1 (kernel row 0)
        p1 = block[1:rows + 1]       # image rows r   (kernel row 1)
        p2 = block[2:rows + 2]       # image rows r+1 (kernel row 2)

        # Center column taps + bias (register-resident accumulator init).
        acc = bv + (p0 * wk[0][1] + p1 * wk[1][1] + p2 * wk[2][1])

        zcol = jnp.zeros((rows, 1, Ct), jnp.float32)

        # Left column taps (need input col w-1): shift right by one, zero at w == 0.
        s0 = p0 * wk[0][0] + p1 * wk[1][0] + p2 * wk[2][0]
        acc = acc + jnp.concatenate([zcol, s0[:, :W - 1, :]], axis=1)

        # Right column taps (need input col w+1): shift left by one, zero at w == W-1.
        s2 = p0 * wk[0][2] + p1 * wk[1][2] + p2 * wk[2][2]
        acc = acc + jnp.concatenate([s2[:, 1:, :], zcol], axis=1)

        o_ref[0, r0:r0 + rows, :, :] = acc.astype(o_ref.dtype)


def _pick_c_tile(N, H, W, C, itemsize):
    """Largest lane-dense channel slab within the VMEM budget, keeping >=2 grid blocks."""
    budget = 32 * 1024 * 1024  # conservative vs v7x's 64 MiB physical VMEM

    def fits(ct):
        # double-buffered in + out blocks + (tiny) weight/bias blocks
        return 4 * H * W * ct * itemsize + 10 * ct * 4 <= budget

    if C % 128 == 0:
        cands = [ct for ct in (512, 384, 256, 128) if C % ct == 0]
        if C <= 512 and C not in cands:
            cands.insert(0, C)
    else:
        cands = [C]  # lane-sparse fallback (see TODO at top)
    cands = sorted(set(cands), reverse=True)

    fitting = [ct for ct in cands if fits(ct)] or [cands[-1]]
    ct = fitting[0]
    # v7x megacore: avoid a single-block grid when a finer channel split is available.
    if N * (C // ct) < 2:
        for smaller in fitting[1:]:
            if N * (C // smaller) >= 2:
                ct = smaller
                break
    return ct


def dwconv(x_nhwc, weight, bias):
    """Depthwise 3x3 conv, stride 1, padding 1, with bias.

    x_nhwc : (N, H, W, C)
    weight : (3, 3, C)   (PyTorch nn.Conv2d(groups=C) weight (C,1,3,3) transposed)
    bias   : (C,)
    returns: (N, H, W, C)
    """
    N, H, W, C = x_nhwc.shape
    itemsize = jnp.dtype(x_nhwc.dtype).itemsize
    c_tile = _pick_c_tile(N, H, W, C, itemsize)
    n_c = C // c_tile
    b2 = bias.reshape(1, C)

    flops = N * H * W * C * 19  # 9 mul + 9 add + bias add (approx.)
    bytes_accessed = (2 * N * H * W * C * itemsize
                      + weight.size * jnp.dtype(weight.dtype).itemsize
                      + bias.size * jnp.dtype(bias.dtype).itemsize)

    return pl.pallas_call(
        _dwconv_kernel,
        out_shape=jax.ShapeDtypeStruct((N, H, W, C), x_nhwc.dtype),
        grid_spec=pltpu.PrefetchScalarGridSpec(
            num_scalar_prefetch=0,
            # Channel slab outer, batch inner: weight/bias block index is constant across
            # consecutive steps, so Pallas skips their re-DMA.
            grid=(n_c, N),
            in_specs=[
                pl.BlockSpec((1, H, W, c_tile), lambda c, n: (n, 0, 0, c)),
                pl.BlockSpec((3, 3, c_tile), lambda c, n: (0, 0, c)),
                pl.BlockSpec((1, c_tile), lambda c, n: (0, c)),
            ],
            out_specs=pl.BlockSpec((1, H, W, c_tile), lambda c, n: (n, 0, 0, c)),
        ),
        compiler_params=pltpu.CompilerParams(
            dimension_semantics=("parallel", "parallel"),
            vmem_limit_bytes=48 * 1024 * 1024,  # above default scoped limits, < v7x 64 MiB
        ),
        cost_estimate=pl.CostEstimate(
            flops=int(flops), transcendentals=0, bytes_accessed=int(bytes_accessed)),
    )(x_nhwc, weight, b2)


def _reference(x_nhwc, weight, bias):
    # Pure-JAX depthwise conv reference (matches PyTorch nn.Conv2d groups=C semantics).
    C = x_nhwc.shape[-1]
    k = weight.reshape(3, 3, 1, C)  # HWIO with feature_group_count=C
    out = jax.lax.conv_general_dilated(
        x_nhwc.astype(jnp.float32), k.astype(jnp.float32),
        window_strides=(1, 1), padding=((1, 1), (1, 1)),
        dimension_numbers=("NHWC", "HWIO", "NHWC"),
        feature_group_count=C)
    return out + bias.reshape(1, 1, 1, C)


def _make_inputs(key, N, H, W, C, dtype=jnp.float32):
    k_x, k_w, k_b = jax.random.split(key, 3)
    x = jax.random.normal(k_x, (N, H, W, C), dtype=dtype)
    # nn.Conv2d(dim, dim, 3, groups=dim) weight is (C, 1, 3, 3); store as (3, 3, C).
    w_torch_layout = jax.random.normal(k_w, (C, 1, 3, 3), dtype=dtype) * 0.1
    weight = jnp.transpose(w_torch_layout[:, 0, :, :], (1, 2, 0))
    bias = jax.random.normal(k_b, (C,), dtype=dtype) * 0.1
    return x, weight, bias


if __name__ == "__main__":
    key = jax.random.PRNGKey(0)

    # Small demo shape (module default dim=768 uses the same code path with c_tile=384).
    x, weight, bias = _make_inputs(key, N=2, H=16, W=16, C=4)
    out = jax.block_until_ready(dwconv(x, weight, bias))
    ref = _reference(x, weight, bias)
    assert out.shape == x.shape
    assert jnp.allclose(out, ref, atol=1e-4, rtol=1e-4), "mismatch vs reference (C=4)"

    # Lane-dense channel-tiled path: N=1, C=256 -> c_tile=128 (2 channel blocks for v7x).
    x2, w2, b2 = _make_inputs(jax.random.PRNGKey(1), N=1, H=8, W=8, C=256)
    out2 = jax.block_until_ready(dwconv(x2, w2, b2))
    ref2 = _reference(x2, w2, b2)
    assert jnp.allclose(out2, ref2, atol=1e-4, rtol=1e-4), "mismatch vs reference (C=256)"

    print("KERNEL_OK")
</pallas_src>

<mosaic_0001>
module attributes {stable_mosaic.version = 11 : i64} {
  func.func @_dwconv_kernel(%arg0: i32, %arg1: i32, %arg2: memref<1x16x16x4xf32, #tpu.memory_space<vmem>>, %arg3: memref<3x3x4xf32, #tpu.memory_space<vmem>>, %arg4: memref<1x4xf32, #tpu.memory_space<vmem>>, %arg5: memref<1x16x16x4xf32, #tpu.memory_space<vmem>>) attributes {dimension_semantics = [#tpu.dimension_semantics<parallel>, #tpu.dimension_semantics<parallel>], iteration_bounds = array<i64: 1, 2>, scalar_prefetch = 0 : i64, scratch_operands = 0 : i64, tpu.core_type = #tpu.core_type<tc>, window_params = [{transform_indices = @transform_0, window_bounds = array<i64: 1, 16, 16, 4>}, {transform_indices = @transform_1, window_bounds = array<i64: 3, 3, 4>}, {transform_indices = @transform_2, window_bounds = array<i64: 1, 4>}, {transform_indices = @transform_3, window_bounds = array<i64: 1, 16, 16, 4>}]} {
    %c0 = arith.constant 0 : index
    %c0_0 = arith.constant 0 : index
    %c0_1 = arith.constant 0 : index
    %0 = vector.load %arg3[%c0, %c0_0, %c0_1] : memref<3x3x4xf32, #tpu.memory_space<vmem>>, vector<3x3x4xf32>
    %1 = vector.extract_strided_slice %0 {offsets = [0, 0, 0], sizes = [1, 1, 4], strides = [1, 1, 1]} : vector<3x3x4xf32> to vector<1x1x4xf32>
    %2 = vector.shape_cast %1 : vector<1x1x4xf32> to vector<4xf32>
    %3 = vector.extract_strided_slice %0 {offsets = [0, 1, 0], sizes = [1, 1, 4], strides = [1, 1, 1]} : vector<3x3x4xf32> to vector<1x1x4xf32>
    %4 = vector.shape_cast %3 : vector<1x1x4xf32> to vector<4xf32>
    %5 = vector.extract_strided_slice %0 {offsets = [0, 2, 0], sizes = [1, 1, 4], strides = [1, 1, 1]} : vector<3x3x4xf32> to vector<1x1x4xf32>
    %6 = vector.shape_cast %5 : vector<1x1x4xf32> to vector<4xf32>
    %7 = vector.extract_strided_slice %0 {offsets = [1, 0, 0], sizes = [1, 1, 4], strides = [1, 1, 1]} : vector<3x3x4xf32> to vector<1x1x4xf32>
    %8 = vector.shape_cast %7 : vector<1x1x4xf32> to vector<4xf32>
    %9 = vector.extract_strided_slice %0 {offsets = [1, 1, 0], sizes = [1, 1, 4], strides = [1, 1, 1]} : vector<3x3x4xf32> to vector<1x1x4xf32>
    %10 = vector.shape_cast %9 : vector<1x1x4xf32> to vector<4xf32>
    %11 = vector.extract_strided_slice %0 {offsets = [1, 2, 0], sizes = [1, 1, 4], strides = [1, 1, 1]} : vector<3x3x4xf32> to vector<1x1x4xf32>
    %12 = vector.shape_cast %11 : vector<1x1x4xf32> to vector<4xf32>
    %13 = vector.extract_strided_slice %0 {offsets = [2, 0, 0], sizes = [1, 1, 4], strides = [1, 1, 1]} : vector<3x3x4xf32> to vector<1x1x4xf32>
    %14 = vector.shape_cast %13 : vector<1x1x4xf32> to vector<4xf32>
    %15 = vector.extract_strided_slice %0 {offsets = [2, 1, 0], sizes = [1, 1, 4], strides = [1, 1, 1]} : vector<3x3x4xf32> to vector<1x1x4xf32>
    %16 = vector.shape_cast %15 : vector<1x1x4xf32> to vector<4xf32>
    %17 = vector.extract_strided_slice %0 {offsets = [2, 2, 0], sizes = [1, 1, 4], strides = [1, 1, 1]} : vector<3x3x4xf32> to vector<1x1x4xf32>
    %18 = vector.shape_cast %17 : vector<1x1x4xf32> to vector<4xf32>
    %c0_2 = arith.constant 0 : index
    %c0_3 = arith.constant 0 : index
    %19 = vector.load %arg4[%c0_2, %c0_3] : memref<1x4xf32, #tpu.memory_space<vmem>>, vector<1x4xf32>
    %20 = vector.shape_cast %19 : vector<1x4xf32> to vector<4xf32>
    %cst = arith.constant 0.000000e+00 : f32
    %21 = vector.broadcast %cst : f32 to vector<1x16x4xf32>
    %c0_4 = arith.constant 0 : index
    %c0_5 = arith.constant 0 : index
    %c0_6 = arith.constant 0 : index
    %c0_7 = arith.constant 0 : index
    %22 = vector.load %arg2[%c0_4, %c0_5, %c0_6, %c0_7] : memref<1x16x16x4xf32, #tpu.memory_space<vmem>>, vector<1x7x16x4xf32>
    %23 = vector.shape_cast %22 : vector<1x7x16x4xf32> to vector<7x16x4xf32>
    %24 = tpu.concatenate %21, %23 in 0 : vector<1x16x4xf32>, vector<7x16x4xf32> -> vector<8x16x4xf32>
    %25 = vector.extract_strided_slice %24 {offsets = [0, 0, 0], sizes = [6, 16, 4], strides = [1, 1, 1]} : vector<8x16x4xf32> to vector<6x16x4xf32>
    %26 = vector.extract_strided_slice %24 {offsets = [1, 0, 0], sizes = [6, 16, 4], strides = [1, 1, 1]} : vector<8x16x4xf32> to vector<6x16x4xf32>
    %27 = vector.extract_strided_slice %24 {offsets = [2, 0, 0], sizes = [6, 16, 4], strides = [1, 1, 1]} : vector<8x16x4xf32> to vector<6x16x4xf32>
    %28 = vector.shape_cast %4 : vector<4xf32> to vector<1x1x4xf32>
    %29 = vector.broadcast %28 : vector<1x1x4xf32> to vector<6x16x4xf32>
    %30 = arith.mulf %25, %29 : vector<6x16x4xf32>
    %31 = vector.shape_cast %10 : vector<4xf32> to vector<1x1x4xf32>
    %32 = vector.broadcast %31 : vector<1x1x4xf32> to vector<6x16x4xf32>
    %33 = arith.mulf %26, %32 : vector<6x16x4xf32>
    %34 = arith.addf %30, %33 : vector<6x16x4xf32>
    %35 = vector.shape_cast %16 : vector<4xf32> to vector<1x1x4xf32>
    %36 = vector.broadcast %35 : vector<1x1x4xf32> to vector<6x16x4xf32>
    %37 = arith.mulf %27, %36 : vector<6x16x4xf32>
    %38 = arith.addf %34, %37 : vector<6x16x4xf32>
    %39 = vector.shape_cast %20 : vector<4xf32> to vector<1x1x4xf32>
    %40 = vector.broadcast %39 : vector<1x1x4xf32> to vector<6x16x4xf32>
    %41 = arith.addf %40, %38 : vector<6x16x4xf32>
    %cst_8 = arith.constant 0.000000e+00 : f32
    %42 = vector.broadcast %cst_8 : f32 to vector<6x1x4xf32>
    %43 = vector.shape_cast %2 : vector<4xf32> to vector<1x1x4xf32>
    %44 = vector.broadcast %43 : vector<1x1x4xf32> to vector<6x16x4xf32>
    %45 = arith.mulf %25, %44 : vector<6x16x4xf32>
    %46 = vector.shape_cast %8 : vector<4xf32> to vector<1x1x4xf32>
    %47 = vector.broadcast %46 : vector<1x1x4xf32> to vector<6x16x4xf32>
    %48 = arith.mulf %26, %47 : vector<6x16x4xf32>
    %49 = arith.addf %45, %48 : vector<6x16x4xf32>
    %50 = vector.shape_cast %14 : vector<4xf32> to vector<1x1x4xf32>
    %51 = vector.broadcast %50 : vector<1x1x4xf32> to vector<6x16x4xf32>
    %52 = arith.mulf %27, %51 : vector<6x16x4xf32>
    %53 = arith.addf %49, %52 : vector<6x16x4xf32>
    %54 = vector.extract_strided_slice %53 {offsets = [0, 0, 0], sizes = [6, 15, 4], strides = [1, 1, 1]} : vector<6x16x4xf32> to vector<6x15x4xf32>
    %55 = tpu.concatenate %42, %54 in 1 : vector<6x1x4xf32>, vector<6x15x4xf32> -> vector<6x16x4xf32>
    %56 = arith.addf %41, %55 : vector<6x16x4xf32>
    %57 = vector.shape_cast %6 : vector<4xf32> to vector<1x1x4xf32>
    %58 = vector.broadcast %57 : vector<1x1x4xf32> to vector<6x16x4xf32>
    %59 = arith.mulf %25, %58 : vector<6x16x4xf32>
    %60 = vector.shape_cast %12 : vector<4xf32> to vector<1x1x4xf32>
    %61 = vector.broadcast %60 : vector<1x1x4xf32> to vector<6x16x4xf32>
    %62 = arith.mulf %26, %61 : vector<6x16x4xf32>
    %63 = arith.addf %59, %62 : vector<6x16x4xf32>
    %64 = vector.shape_cast %18 : vector<4xf32> to vector<1x1x4xf32>
    %65 = vector.broadcast %64 : vector<1x1x4xf32> to vector<6x16x4xf32>
    %66 = arith.mulf %27, %65 : vector<6x16x4xf32>
    %67 = arith.addf %63, %66 : vector<6x16x4xf32>
    %68 = vector.extract_strided_slice %67 {offsets = [0, 1, 0], sizes = [6, 15, 4], strides = [1, 1, 1]} : vector<6x16x4xf32> to vector<6x15x4xf32>
    %69 = tpu.concatenate %68, %42 in 1 : vector<6x15x4xf32>, vector<6x1x4xf32> -> vector<6x16x4xf32>
    %70 = arith.addf %56, %69 : vector<6x16x4xf32>
    %c0_9 = arith.constant 0 : index
    %c0_10 = arith.constant 0 : index
    %c0_11 = arith.constant 0 : index
    %c0_12 = arith.constant 0 : index
    %71 = vector.load %arg5[%c0_9, %c0_10, %c0_11, %c0_12] : memref<1x16x16x4xf32, #tpu.memory_space<vmem>>, vector<1x6x16x4xf32>
    %72 = vector.shape_cast %71 : vector<1x6x16x4xf32> to vector<6x16x4xf32>
    %73 = vector.shape_cast %70 : vector<6x16x4xf32> to vector<1x6x16x4xf32>
    tpu.vector_store %arg5[%c0_9, %c0_10, %c0_11, %c0_12], %73 {strides = array<i32>} : memref<1x16x16x4xf32, #tpu.memory_space<vmem>>, vector<1x6x16x4xf32>,
    %c0_13 = arith.constant 0 : index
    %c5 = arith.constant 5 : index
    %c0_14 = arith.constant 0 : index
    %c0_15 = arith.constant 0 : index
    %74 = vector.load %arg2[%c0_13, %c5, %c0_14, %c0_15] : memref<1x16x16x4xf32, #tpu.memory_space<vmem>>, vector<1x8x16x4xf32>
    %75 = vector.shape_cast %74 : vector<1x8x16x4xf32> to vector<8x16x4xf32>
    %76 = vector.extract_strided_slice %75 {offsets = [0, 0, 0], sizes = [6, 16, 4], strides = [1, 1, 1]} : vector<8x16x4xf32> to vector<6x16x4xf32>
    %77 = vector.extract_strided_slice %75 {offsets = [1, 0, 0], sizes = [6, 16, 4], strides = [1, 1, 1]} : vector<8x16x4xf32> to vector<6x16x4xf32>
    %78 = vector.extract_strided_slice %75 {offsets = [2, 0, 0], sizes = [6, 16, 4], strides = [1, 1, 1]} : vector<8x16x4xf32> to vector<6x16x4xf32>
    %79 = vector.shape_cast %4 : vector<4xf32> to vector<1x1x4xf32>
    %80 = vector.broadcast %79 : vector<1x1x4xf32> to vector<6x16x4xf32>
    %81 = arith.mulf %76, %80 : vector<6x16x4xf32>
    %82 = vector.shape_cast %10 : vector<4xf32> to vector<1x1x4xf32>
    %83 = vector.broadcast %82 : vector<1x1x4xf32> to vector<6x16x4xf32>
    %84 = arith.mulf %77, %83 : vector<6x16x4xf32>
    %85 = arith.addf %81, %84 : vector<6x16x4xf32>
    %86 = vector.shape_cast %16 : vector<4xf32> to vector<1x1x4xf32>
    %87 = vector.broadcast %86 : vector<1x1x4xf32> to vector<6x16x4xf32>
    %88 = arith.mulf %78, %87 : vector<6x16x4xf32>
    %89 = arith.addf %85, %88 : vector<6x16x4xf32>
    %90 = vector.shape_cast %20 : vector<4xf32> to vector<1x1x4xf32>
    %91 = vector.broadcast %90 : vector<1x1x4xf32> to vector<6x16x4xf32>
    %92 = arith.addf %91, %89 : vector<6x16x4xf32>
    %cst_16 = arith.constant 0.000000e+00 : f32
    %93 = vector.broadcast %cst_16 : f32 to vector<6x1x4xf32>
    %94 = vector.shape_cast %2 : vector<4xf32> to vector<1x1x4xf32>
    %95 = vector.broadcast %94 : vector<1x1x4xf32> to vector<6x16x4xf32>
    %96 = arith.mulf %76, %95 : vector<6x16x4xf32>
    %97 = vector.shape_cast %8 : vector<4xf32> to vector<1x1x4xf32>
    %98 = vector.broadcast %97 : vector<1x1x4xf32> to vector<6x16x4xf32>
    %99 = arith.mulf %77, %98 : vector<6x16x4xf32>
    %100 = arith.addf %96, %99 : vector<6x16x4xf32>
    %101 = vector.shape_cast %14 : vector<4xf32> to vector<1x1x4xf32>
    %102 = vector.broadcast %101 : vector<1x1x4xf32> to vector<6x16x4xf32>
    %103 = arith.mulf %78, %102 : vector<6x16x4xf32>
    %104 = arith.addf %100, %103 : vector<6x16x4xf32>
    %105 = vector.extract_strided_slice %104 {offsets = [0, 0, 0], sizes = [6, 15, 4], strides = [1, 1, 1]} : vector<6x16x4xf32> to vector<6x15x4xf32>
    %106 = tpu.concatenate %93, %105 in 1 : vector<6x1x4xf32>, vector<6x15x4xf32> -> vector<6x16x4xf32>
    %107 = arith.addf %92, %106 : vector<6x16x4xf32>
    %108 = vector.shape_cast %6 : vector<4xf32> to vector<1x1x4xf32>
    %109 = vector.broadcast %108 : vector<1x1x4xf32> to vector<6x16x4xf32>
    %110 = arith.mulf %76, %109 : vector<6x16x4xf32>
    %111 = vector.shape_cast %12 : vector<4xf32> to vector<1x1x4xf32>
    %112 = vector.broadcast %111 : vector<1x1x4xf32> to vector<6x16x4xf32>
    %113 = arith.mulf %77, %112 : vector<6x16x4xf32>
    %114 = arith.addf %110, %113 : vector<6x16x4xf32>
    %115 = vector.shape_cast %18 : vector<4xf32> to vector<1x1x4xf32>
    %116 = vector.broadcast %115 : vector<1x1x4xf32> to vector<6x16x4xf32>
    %117 = arith.mulf %78, %116 : vector<6x16x4xf32>
    %118 = arith.addf %114, %117 : vector<6x16x4xf32>
    %119 = vector.extract_strided_slice %118 {offsets = [0, 1, 0], sizes = [6, 15, 4], strides = [1, 1, 1]} : vector<6x16x4xf32> to vector<6x15x4xf32>
    %120 = tpu.concatenate %119, %93 in 1 : vector<6x15x4xf32>, vector<6x1x4xf32> -> vector<6x16x4xf32>
    %121 = arith.addf %107, %120 : vector<6x16x4xf32>
    %c0_17 = arith.constant 0 : index
    %c6 = arith.constant 6 : index
    %c0_18 = arith.constant 0 : index
    %c0_19 = arith.constant 0 : index
    %122 = vector.load %arg5[%c0_17, %c6, %c0_18, %c0_19] : memref<1x16x16x4xf32, #tpu.memory_space<vmem>>, vector<1x6x16x4xf32>
    %123 = vector.shape_cast %122 : vector<1x6x16x4xf32> to vector<6x16x4xf32>
    %124 = vector.shape_cast %121 : vector<6x16x4xf32> to vector<1x6x16x4xf32>
    tpu.vector_store %arg5[%c0_17, %c6, %c0_18, %c0_19], %124 {strides = array<i32>} : memref<1x16x16x4xf32, #tpu.memory_space<vmem>>, vector<1x6x16x4xf32>,
    %c0_20 = arith.constant 0 : index
    %c11 = arith.constant 11 : index
    %c0_21 = arith.constant 0 : index
    %c0_22 = arith.constant 0 : index
    %125 = vector.load %arg2[%c0_20, %c11, %c0_21, %c0_22] : memref<1x16x16x4xf32, #tpu.memory_space<vmem>>, vector<1x5x16x4xf32>
    %126 = vector.shape_cast %125 : vector<1x5x16x4xf32> to vector<5x16x4xf32>
    %cst_23 = arith.constant 0.000000e+00 : f32
    %127 = vector.broadcast %cst_23 : f32 to vector<1x16x4xf32>
    %128 = tpu.concatenate %126, %127 in 0 : vector<5x16x4xf32>, vector<1x16x4xf32> -> vector<6x16x4xf32>
    %129 = vector.extract_strided_slice %128 {offsets = [0, 0, 0], sizes = [4, 16, 4], strides = [1, 1, 1]} : vector<6x16x4xf32> to vector<4x16x4xf32>
    %130 = vector.extract_strided_slice %128 {offsets = [1, 0, 0], sizes = [4, 16, 4], strides = [1, 1, 1]} : vector<6x16x4xf32> to vector<4x16x4xf32>
    %131 = vector.extract_strided_slice %128 {offsets = [2, 0, 0], sizes = [4, 16, 4], strides = [1, 1, 1]} : vector<6x16x4xf32> to vector<4x16x4xf32>
    %132 = vector.shape_cast %4 : vector<4xf32> to vector<1x1x4xf32>
    %133 = vector.broadcast %132 : vector<1x1x4xf32> to vector<4x16x4xf32>
    %134 = arith.mulf %129, %133 : vector<4x16x4xf32>
    %135 = vector.shape_cast %10 : vector<4xf32> to vector<1x1x4xf32>
    %136 = vector.broadcast %135 : vector<1x1x4xf32> to vector<4x16x4xf32>
    %137 = arith.mulf %130, %136 : vector<4x16x4xf32>
    %138 = arith.addf %134, %137 : vector<4x16x4xf32>
    %139 = vector.shape_cast %16 : vector<4xf32> to vector<1x1x4xf32>
    %140 = vector.broadcast %139 : vector<1x1x4xf32> to vector<4x16x4xf32>
    %141 = arith.mulf %131, %140 : vector<4x16x4xf32>
    %142 = arith.addf %138, %141 : vector<4x16x4xf32>
    %143 = vector.shape_cast %20 : vector<4xf32> to vector<1x1x4xf32>
    %144 = vector.broadcast %143 : vector<1x1x4xf32> to vector<4x16x4xf32>
    %145 = arith.addf %144, %142 : vector<4x16x4xf32>
    %cst_24 = arith.constant 0.000000e+00 : f32
    %146 = vector.broadcast %cst_24 : f32 to vector<4x1x4xf32>
    %147 = vector.shape_cast %2 : vector<4xf32> to vector<1x1x4xf32>
    %148 = vector.broadcast %147 : vector<1x1x4xf32> to vector<4x16x4xf32>
    %149 = arith.mulf %129, %148 : vector<4x16x4xf32>
    %150 = vector.shape_cast %8 : vector<4xf32> to vector<1x1x4xf32>
    %151 = vector.broadcast %150 : vector<1x1x4xf32> to vector<4x16x4xf32>
    %152 = arith.mulf %130, %151 : vector<4x16x4xf32>
    %153 = arith.addf %149, %152 : vector<4x16x4xf32>
    %154 = vector.shape_cast %14 : vector<4xf32> to vector<1x1x4xf32>
    %155 = vector.broadcast %154 : vector<1x1x4xf32> to vector<4x16x4xf32>
    %156 = arith.mulf %131, %155 : vector<4x16x4xf32>
    %157 = arith.addf %153, %156 : vector<4x16x4xf32>
    %158 = vector.extract_strided_slice %157 {offsets = [0, 0, 0], sizes = [4, 15, 4], strides = [1, 1, 1]} : vector<4x16x4xf32> to vector<4x15x4xf32>
    %159 = tpu.concatenate %146, %158 in 1 : vector<4x1x4xf32>, vector<4x15x4xf32> -> vector<4x16x4xf32>
    %160 = arith.addf %145, %159 : vector<4x16x4xf32>
    %161 = vector.shape_cast %6 : vector<4xf32> to vector<1x1x4xf32>
    %162 = vector.broadcast %161 : vector<1x1x4xf32> to vector<4x16x4xf32>
    %163 = arith.mulf %129, %162 : vector<4x16x4xf32>
    %164 = vector.shape_cast %12 : vector<4xf32> to vector<1x1x4xf32>
    %165 = vector.broadcast %164 : vector<1x1x4xf32> to vector<4x16x4xf32>
    %166 = arith.mulf %130, %165 : vector<4x16x4xf32>
    %167 = arith.addf %163, %166 : vector<4x16x4xf32>
    %168 = vector.shape_cast %18 : vector<4xf32> to vector<1x1x4xf32>
    %169 = vector.broadcast %168 : vector<1x1x4xf32> to vector<4x16x4xf32>
    %170 = arith.mulf %131, %169 : vector<4x16x4xf32>
    %171 = arith.addf %167, %170 : vector<4x16x4xf32>
    %172 = vector.extract_strided_slice %171 {offsets = [0, 1, 0], sizes = [4, 15, 4], strides = [1, 1, 1]} : vector<4x16x4xf32> to vector<4x15x4xf32>
    %173 = tpu.concatenate %172, %146 in 1 : vector<4x15x4xf32>, vector<4x1x4xf32> -> vector<4x16x4xf32>
    %174 = arith.addf %160, %173 : vector<4x16x4xf32>
    %c0_25 = arith.constant 0 : index
    %c12 = arith.constant 12 : index
    %c0_26 = arith.constant 0 : index
    %c0_27 = arith.constant 0 : index
    %175 = vector.load %arg5[%c0_25, %c12, %c0_26, %c0_27] : memref<1x16x16x4xf32, #tpu.memory_space<vmem>>, vector<1x4x16x4xf32>
    %176 = vector.shape_cast %175 : vector<1x4x16x4xf32> to vector<4x16x4xf32>
    %177 = vector.shape_cast %174 : vector<4x16x4xf32> to vector<1x4x16x4xf32>
    tpu.vector_store %arg5[%c0_25, %c12, %c0_26, %c0_27], %177 {strides = array<i32>} : memref<1x16x16x4xf32, #tpu.memory_space<vmem>>, vector<1x4x16x4xf32>,
    return
  }
  func.func @transform_0(%arg0: i32, %arg1: i32) -> (i32, i32, i32, i32) {
    %c0_i32 = arith.constant 0 : i32
    %c0_i32_0 = arith.constant 0 : i32
    %c0_i32_1 = arith.constant 0 : i32
    return %arg1, %c0_i32, %c0_i32_0, %arg0 : i32, i32, i32, i32
  }
  func.func @transform_1(%arg0: i32, %arg1: i32) -> (i32, i32, i32) {
    %c0_i32 = arith.constant 0 : i32
    %c0_i32_0 = arith.constant 0 : i32
    %c0_i32_1 = arith.constant 0 : i32
    return %c0_i32, %c0_i32_0, %arg0 : i32, i32, i32
  }
  func.func @transform_2(%arg0: i32, %arg1: i32) -> (i32, i32) {
    %c0_i32 = arith.constant 0 : i32
    %c0_i32_0 = arith.constant 0 : i32
    return %c0_i32, %arg0 : i32, i32
  }
  func.func @transform_3(%arg0: i32, %arg1: i32) -> (i32, i32, i32, i32) {
    %c0_i32 = arith.constant 0 : i32
    %c0_i32_0 = arith.constant 0 : i32
    %c0_i32_1 = arith.constant 0 : i32
    return %arg1, %c0_i32, %c0_i32_0, %arg0 : i32, i32, i32, i32
  }
}

</mosaic_0001>

<bundles_post_ra>
// kernel: tpu_custom_call.1
= control target key start
LH: loop header
LB: loop body
LE: loop exit
PB: predicated region body
PF: predicated region fallthrough
CT: control target
= control target key end

     0   :  { %s1426_s12 = smov 0   ;;  %s1428_s13 = smov 0   ;;  %s2313_s0 = inlined_call_operand.vmem [shape: f32[2,16,16,4], index: 0, kind: input, shape index: {}]   ;;  %s2314_s1 = inlined_call_operand.vmem [shape: f32[3,3,4], index: 1, kind: input, shape index: {}]   ;;  %s2315_s2 = inlined_call_operand.vmem [shape: f32[1,4], index: 2, kind: input, shape index: {}]   ;;  %s2316_s3 = inlined_call_operand.vmem [shape: f32[2,16,16,4], index: 3, kind: output, shape index: {}]  }
   0x1   :  { %s1430_s14 = smov 0  }
   0x2 LB: > { %s22_s15 = sadd.s32 1, %s1400_s13  ;;  %p1301_p0 = scmp.ge.s32.totalorder %s1404_s14, 1  ;;  %s1404_s14 = sphi %s1430_s14, %s13_s14   ;;  %s1400_s13 = sphi %s1428_s13, %s2318_s13   ;;  %s1396_s12 = sphi %s1426_s12, %s2317_s12  }
   0x3   : > { %p23_p1 = scmp.ge.s32.totalorder %s22_s15, 2  ;;  %p173_p2 = scmp.lt.s32.totalorder %s1404_s14, 3 }
   0x5   : > { %s2320_s15 = smov (%p23_p1, %s22_s15), 0  ;;  %p174_p3 = pnand %p1301_p0, %p173_p2 }
   0x6   : > { %p210_p4 = scmp.lt.s32.totalorder (!%p174_p3), %s1396_s12, 1  ;;  %v251_v0 = vlaneseq (!%p174_p3)  ;;  %v233_v2 = vld [vmem:[%s2314_s1] sm:$0x7] (!%p174_p3)  ;;  %v234_v3 = vld [vmem:[%s2314_s1 + $0x4] sm:$0x7] (!%p174_p3)  ;;  %vm423_vm0 = vcmask (!%p174_p3), 1040384  }
   0x7   : > { %177 = sbr.rel (%p174_p3) target bundleno = 201 (0xc9), region = 32  ;;  %v235_v4 = vld [vmem:[%s2314_s1 + $0x8] sm:$0x7] (!%p174_p3)  ;;  %vm555_vm1 = vcmask (!%p174_p3), 1046528   ;;  %v1513_v32 = vld [vmem:[%s2315_s2] ss:$0 sm:$0xff] (!%p174_p3) }
   0x8   : > { %v252_v1 = vshrl.u32 (!%p174_p3), %v251_v0, 7  ;;  %vm604_vm2 = vcmask (!%p174_p3), 31744  }
   0xa   : > { %v253_v5 = vsub.s32 (!%p174_p3), 1, %v252_v1  ;;  %v342_v6 = vsub.s32 (!%p174_p3), 0, %v252_v1  ;;  %v474_v7 = vsub.s32 (!%p174_p3), 2, %v252_v1 }
   0xc   : > { %v1466_v9 = vrot.slane (!%p174_p3), %v233_v2, %v253_v5  ;;  %v1468_v10 = vrot.slane (!%p174_p3), %v234_v3, %v253_v5  ;;  %v1470_v11 = vrot.slane (!%p174_p3), %v235_v4, %v253_v5  ;;  %v1472_v12 = vrot.slane (!%p174_p3), %v233_v2, %v342_v6 }
   0xd   : > { %v1480_v15 = vrot.slane (!%p174_p3), %v234_v3, %v342_v6  ;;  %v1482_v16 = vrot.slane (!%p174_p3), %v235_v4, %v342_v6  ;;  %v1484_v17 = vrot.slane (!%p174_p3), %v233_v2, %v474_v7  ;;  %v1486_v18 = vrot.slane (!%p174_p3), %v234_v3, %v474_v7 }
   0xe   : > { %s2322_s12 = smov (!%p210_p4, %s1396_s12), 1  ;;  %v255_v19 = vmul.f32 0.0, %v1466_v9  ;;  %v344_v22 = vmul.f32 0.0, %v1472_v12  ;;  %v1506_v30 = vrot.slane %v235_v4, %v474_v7 }
   0xf   : > { %s1355_s22 = sshll.u32 %s2322_s12, 8  ;;  %v476_v25 = vmul.f32 0.0, %v1484_v17 }
  0x10   : > { %s1461_s25 = scalar_lea.vmem %s2313_s0, %s1355_s22  ;;  %s1548_s30 = scalar_lea.vmem %s2316_s3, %s1355_s22 }
  0x11   : > { %v1464_v8 = vld [vmem:[%s1461_s25] sm:$0xff]  ;;  %v1475_v13 = vld [vmem:[%s1461_s25 + $0x8] sm:$0xff]  ;;  %v1478_v14 = vld [vmem:[%s1461_s25 + $0x10] sm:$0xff] }
  0x12   : > { %v270_v20 = vmul.f32 %v1468_v10, %v1464_v8  ;;  %v298_v21 = vmul.f32 %v1470_v11, %v1478_v14  ;;  %v359_v23 = vmul.f32 %v1480_v15, %v1464_v8  ;;  %v387_v24 = vmul.f32 %v1482_v16, %v1478_v14  ;;  %v1502_v27 = vld [vmem:[%s1461_s25 + $0x18] sm:$0xff]  ;;  %v1529_v52 = vld [vmem:[%s1461_s25 + $0x20] sm:$0xff] }
  0x13   : > { %v491_v26 = vmul.f32 %v1486_v18, %v1464_v8  ;;  %v492_v29 = vmul.f32 %v1486_v18, %v1475_v13  ;;  %v271_v31 = vmul.f32 %v1468_v10, %v1475_v13  ;;  %v299_v35 = vmul.f32 %v1470_v11, %v1502_v27 }
  0x14   : > { %v282_v28 = vadd.f32 %v270_v20, %v255_v19  ;;  %v371_v33 = vadd.f32 %v359_v23, %v344_v22  ;;  %v360_v36 = vmul.f32 %v1480_v15, %v1475_v13  ;;  %v519_v39 = vmul.f32 %v1506_v30, %v1478_v14 }
  0x15   : > { %v503_v34 = vadd.f32 %v491_v26, %v476_v25  ;;  %v504_v38 = vadd.f32 %v492_v29, %v476_v25  ;;  %v520_v40 = vmul.f32 %v1506_v30, %v1502_v27  ;;  %v283_v42 = vadd.f32 %v271_v31, %v255_v19 }
  0x16   : > { %v310_v37 = vadd.f32 %v298_v21, %v282_v28  ;;  %v399_v41 = vadd.f32 %v387_v24, %v371_v33  ;;  %v372_v43 = vadd.f32 %v360_v36, %v344_v22  ;;  %v388_v44 = vmul.f32 %v1482_v16, %v1502_v27  ;;  %v1558_v21 = vld [vmem:[%s1461_s25 + $0x28] sm:$0xff] }
  0x17   : > { %v531_v46 = vadd.f32 %v519_v39, %v503_v34  ;;  %v532_v47 = vadd.f32 %v520_v40, %v504_v38  ;;  %v256_v48 = vmul.f32 %v1466_v9, %v1464_v8  ;;  %v311_v50 = vadd.f32 %v299_v35, %v283_v42 }
  0x18   : > { %v328_v45 = vadd.f32 %v1513_v32, %v310_v37  ;;  %v424_v49 = vrot.slane %v399_v41, 7  ;;  %v400_v51 = vadd.f32 %v388_v44, %v372_v43  ;;  %v272_v53 = vmul.f32 %v1468_v10, %v1478_v14  ;;  %v1586_v43 = vld [vmem:[%s1461_s25 + $0x30] sm:$0xff] }
  0x19   : > { %v556_v54 = vrot.slane %v531_v46, 1  ;;  %v557_v55 = vrot.slane %v532_v47, 1  ;;  %v300_v56 = vmul.f32 %v1470_v11, %v1529_v52  ;;  %v345_v57 = vmul.f32 %v1472_v12, %v1464_v8 }
  0x1a   : > { %v454_v58 = vsel %vm423_vm0, 0.0, %v424_v49  ;;  %v329_v59 = vadd.f32 %v1513_v32, %v311_v50  ;;  %v425_v60 = vrot.slane %v400_v51, 7  ;;  %v284_v61 = vadd.f32 %v272_v53, %v256_v48 }
  0x1b   : > { %v460_v62 = vadd.f32 %v454_v58, %v328_v45  ;;  %v558_v63 = vsel %vm555_vm1, %v556_v54, %v557_v55  ;;  %v586_v0 = vsel %vm555_vm1, %v557_v55, 0.0  ;;  %v361_v1 = vmul.f32 %v1480_v15, %v1478_v14 }
  0x1c   : > { %v426_v2 = vsel %vm423_vm0, %v424_v49, %v425_v60  ;;  %v312_v3 = vadd.f32 %v300_v56, %v284_v61  ;;  %v389_v4 = vmul.f32 %v1482_v16, %v1529_v52  ;;  %v477_v5 = vmul.f32 %v1484_v17, %v1464_v8 }
  0x1d   : > { %v592_v6 = vadd.f32 %v558_v63, %v460_v62  ;;  %v461_v7 = vadd.f32 %v426_v2, %v329_v59  ;;  %v373_v19 = vadd.f32 %v361_v1, %v345_v57  ;;  %v478_v20 = vmul.f32 %v1484_v17, %v1475_v13 }
  0x1e   : > { %v330_v22 = vadd.f32 %v1513_v32, %v312_v3  ;;  %v493_v23 = vmul.f32 %v1486_v18, %v1478_v14  ;;  %v494_v24 = vmul.f32 %v1486_v18, %v1502_v27  ;;  %v521_v8 = vmul.f32 %v1506_v30, %v1529_v52 }
  0x1f   : > { %605 = vst.msk [vmem:[%s1548_s30] sm:$0xff] %vm604_vm2, %v592_v6  ;;  %v593_v25 = vadd.f32 %v586_v0, %v461_v7  ;;  %v401_v26 = vadd.f32 %v389_v4, %v373_v19  ;;  %v522_v28 = vmul.f32 %v1506_v30, %v1558_v21  ;;  %v257_v29 = vmul.f32 %v1466_v9, %v1475_v13  ;;  %v1616_v6 = vld [vmem:[%s1461_s25 + $0x38] sm:$0xff] }
  0x20   : > { %v505_v31 = vadd.f32 %v493_v23, %v477_v5  ;;  %v506_v33 = vadd.f32 %v494_v24, %v478_v20  ;;  %v273_v34 = vmul.f32 %v1468_v10, %v1502_v27  ;;  %v301_v35 = vmul.f32 %v1470_v11, %v1558_v21 }
  0x21   : > { %606 = vst.msk [vmem:[%s1548_s30 + $0x8] sm:$0xff] %vm604_vm2, %v593_v25  ;;  %v427_v36 = vrot.slane %v401_v26, 7  ;;  %v346_v37 = vmul.f32 %v1472_v12, %v1475_v13  ;;  %v362_v38 = vmul.f32 %v1480_v15, %v1502_v27  ;;  %v390_v39 = vmul.f32 %v1482_v16, %v1558_v21 }
  0x22   : > { %v533_v40 = vadd.f32 %v521_v8, %v505_v31  ;;  %v534_v41 = vadd.f32 %v522_v28, %v506_v33  ;;  %v285_v42 = vadd.f32 %v273_v34, %v257_v29  ;;  %v258_v44 = vmul.f32 %v1466_v9, %v1478_v14 }
  0x23   : > { %v455_v45 = vsel %vm423_vm0, 0.0, %v427_v36  ;;  %v374_v46 = vadd.f32 %v362_v38, %v346_v37  ;;  %v274_v13 = vmul.f32 %v1468_v10, %v1529_v52  ;;  %v302_v47 = vmul.f32 %v1470_v11, %v1586_v43 }
  0x24   : > { %v462_v48 = vadd.f32 %v455_v45, %v330_v22  ;;  %v559_v49 = vrot.slane %v533_v40, 1  ;;  %v560_v50 = vrot.slane %v534_v41, 1  ;;  %v313_v51 = vadd.f32 %v301_v35, %v285_v42  ;;  %v1639_v42 = vld [vmem:[%s1461_s25 + $0x40] sm:$0xff] }
  0x25   : > { %v402_v53 = vadd.f32 %v390_v39, %v374_v46  ;;  %v286_v54 = vadd.f32 %v274_v13, %v258_v44  ;;  %v347_v55 = vmul.f32 %v1472_v12, %v1478_v14  ;;  %v363_v56 = vmul.f32 %v1480_v15, %v1529_v52 }
  0x26   : > { %v561_v57 = vsel %vm555_vm1, %v559_v49, %v560_v50  ;;  %v331_v58 = vadd.f32 %v1513_v32, %v313_v51  ;;  %v587_v59 = vsel %vm555_vm1, %v560_v50, 0.0  ;;  %v391_v60 = vmul.f32 %v1482_v16, %v1586_v43 }
  0x27   : > { %v594_v61 = vadd.f32 %v561_v57, %v462_v48  ;;  %v428_v62 = vrot.slane %v402_v53, 7  ;;  %v314_v63 = vadd.f32 %v302_v47, %v286_v54  ;;  %v375_v0 = vadd.f32 %v363_v56, %v347_v55 }
  0x28   : > { %v479_v1 = vmul.f32 %v1484_v17, %v1478_v14  ;;  %v480_v2 = vmul.f32 %v1484_v17, %v1502_v27  ;;  %v495_v3 = vmul.f32 %v1486_v18, %v1529_v52  ;;  %v496_v4 = vmul.f32 %v1486_v18, %v1558_v21 }
  0x29   : > { %607 = vst.msk [vmem:[%s1548_s30 + $0x10] sm:$0xff] %vm604_vm2, %v594_v61  ;;  %v429_v5 = vsel %vm423_vm0, %v427_v36, %v428_v62  ;;  %v332_v7 = vadd.f32 %v1513_v32, %v314_v63  ;;  %v403_v19 = vadd.f32 %v391_v60, %v375_v0  ;;  %v523_v14 = vmul.f32 %v1506_v30, %v1586_v43  ;;  %v1663_v61 = vld [vmem:[%s1461_s25 + $0x48] sm:$0xff] }
  0x2a   : > { %v463_v20 = vadd.f32 %v429_v5, %v331_v58  ;;  %v507_v22 = vadd.f32 %v495_v3, %v479_v1  ;;  %v508_v23 = vadd.f32 %v496_v4, %v480_v2  ;;  %v524_v24 = vmul.f32 %v1506_v30, %v1616_v6 }
  0x2b   : > { %v430_v8 = vrot.slane %v403_v19, 7  ;;  %v259_v25 = vmul.f32 %v1466_v9, %v1502_v27  ;;  %v275_v26 = vmul.f32 %v1468_v10, %v1558_v21  ;;  %v303_v28 = vmul.f32 %v1470_v11, %v1616_v6 }
  0x2c   : > { %v595_v29 = vadd.f32 %v587_v59, %v463_v20  ;;  %v535_v31 = vadd.f32 %v523_v14, %v507_v22  ;;  %v536_v33 = vadd.f32 %v524_v24, %v508_v23  ;;  %v348_v34 = vmul.f32 %v1472_v12, %v1502_v27 }
  0x2d   : > { %v456_v35 = vsel %vm423_vm0, 0.0, %v430_v8  ;;  %v287_v36 = vadd.f32 %v275_v26, %v259_v25  ;;  %v364_v37 = vmul.f32 %v1480_v15, %v1558_v21  ;;  %v392_v38 = vmul.f32 %v1482_v16, %v1616_v6 }
  0x2e   : > { %608 = vst.msk [vmem:[%s1548_s30 + $0x18] sm:$0xff] %vm604_vm2, %v595_v29  ;;  %v464_v39 = vadd.f32 %v456_v35, %v332_v7  ;;  %v562_v40 = vrot.slane %v535_v31, 1  ;;  %v563_v41 = vrot.slane %v536_v33, 1  ;;  %v260_v44 = vmul.f32 %v1466_v9, %v1529_v52 }
  0x2f   : > { %v315_v27 = vadd.f32 %v303_v28, %v287_v36  ;;  %v376_v45 = vadd.f32 %v364_v37, %v348_v34  ;;  %v276_v46 = vmul.f32 %v1468_v10, %v1586_v43  ;;  %v304_v13 = vmul.f32 %v1470_v11, %v1639_v42 }
  0x30   : > { %v564_v47 = vsel %vm555_vm1, %v562_v40, %v563_v41  ;;  %v588_v48 = vsel %vm555_vm1, %v563_v41, 0.0  ;;  %v349_v49 = vmul.f32 %v1472_v12, %v1529_v52  ;;  %v365_v50 = vmul.f32 %v1480_v15, %v1586_v43 }
  0x31   : > { %v596_v51 = vadd.f32 %v564_v47, %v464_v39  ;;  %v333_v53 = vadd.f32 %v1513_v32, %v315_v27  ;;  %v404_v54 = vadd.f32 %v392_v38, %v376_v45  ;;  %v288_v55 = vadd.f32 %v276_v46, %v260_v44  ;;  %v1689_v38 = vld [vmem:[%s1461_s25 + $0x50] sm:$0xff] }
  0x32   : > { %v377_v56 = vadd.f32 %v365_v50, %v349_v49  ;;  %v393_v57 = vmul.f32 %v1482_v16, %v1639_v42  ;;  %v481_v58 = vmul.f32 %v1484_v17, %v1529_v52  ;;  %v482_v59 = vmul.f32 %v1484_v17, %v1558_v21 }
  0x33   : > { %609 = vst.msk [vmem:[%s1548_s30 + $0x20] sm:$0xff] %vm604_vm2, %v596_v51  ;;  %v431_v60 = vrot.slane %v404_v54, 7  ;;  %v316_v62 = vadd.f32 %v304_v13, %v288_v55  ;;  %v497_v63 = vmul.f32 %v1486_v18, %v1586_v43  ;;  %v498_v0 = vmul.f32 %v1486_v18, %v1616_v6  ;;  %v1715_v55 = vld [vmem:[%s1461_s25 + $0x58] sm:$0xff] }
  0x34   : > { %v405_v1 = vadd.f32 %v393_v57, %v377_v56  ;;  %v525_v2 = vmul.f32 %v1506_v30, %v1639_v42  ;;  %v526_v52 = vmul.f32 %v1506_v30, %v1663_v61  ;;  %v261_v3 = vmul.f32 %v1466_v9, %v1558_v21 }
  0x35   : > { %v432_v4 = vsel %vm423_vm0, %v430_v8, %v431_v60  ;;  %v334_v5 = vadd.f32 %v1513_v32, %v316_v62  ;;  %v509_v7 = vadd.f32 %v497_v63, %v481_v58  ;;  %v510_v19 = vadd.f32 %v498_v0, %v482_v59 }
  0x36   : > { %v465_v14 = vadd.f32 %v432_v4, %v333_v53  ;;  %v433_v20 = vrot.slane %v405_v1, 7  ;;  %v277_v22 = vmul.f32 %v1468_v10, %v1616_v6  ;;  %v305_v23 = vmul.f32 %v1470_v11, %v1663_v61 }
  0x37   : > { %v537_v24 = vadd.f32 %v525_v2, %v509_v7  ;;  %v538_v25 = vadd.f32 %v526_v52, %v510_v19  ;;  %v350_v26 = vmul.f32 %v1472_v12, %v1558_v21  ;;  %v366_v8 = vmul.f32 %v1480_v15, %v1616_v6 }
  0x38   : > { %v597_v28 = vadd.f32 %v588_v48, %v465_v14  ;;  %v457_v29 = vsel %vm423_vm0, 0.0, %v433_v20  ;;  %v289_v31 = vadd.f32 %v277_v22, %v261_v3  ;;  %v394_v33 = vmul.f32 %v1482_v16, %v1663_v61 }
  0x39   : > { %v466_v34 = vadd.f32 %v457_v29, %v334_v5  ;;  %v565_v35 = vrot.slane %v537_v24, 1  ;;  %v566_v36 = vrot.slane %v538_v25, 1  ;;  %v378_v37 = vadd.f32 %v366_v8, %v350_v26  ;;  %v1745_v29 = vld [vmem:[%s1461_s25 + $0x60] sm:$0xff] }
  0x3a   : > { %610 = vst.msk [vmem:[%s1548_s30 + $0x28] sm:$0xff] %vm604_vm2, %v597_v28  ;;  %v317_v39 = vadd.f32 %v305_v23, %v289_v31  ;;  %v262_v21 = vmul.f32 %v1466_v9, %v1586_v43  ;;  %v278_v40 = vmul.f32 %v1468_v10, %v1639_v42  ;;  %v306_v41 = vmul.f32 %v1470_v11, %v1689_v38 }
  0x3b   : > { %v567_v44 = vsel %vm555_vm1, %v565_v35, %v566_v36  ;;  %v406_v27 = vadd.f32 %v394_v33, %v378_v37  ;;  %v589_v45 = vsel %vm555_vm1, %v566_v36, 0.0  ;;  %v351_v46 = vmul.f32 %v1472_v12, %v1586_v43 }
  0x3c   : > { %v598_v13 = vadd.f32 %v567_v44, %v466_v34  ;;  %v335_v47 = vadd.f32 %v1513_v32, %v317_v39  ;;  %v290_v48 = vadd.f32 %v278_v40, %v262_v21  ;;  %v367_v49 = vmul.f32 %v1480_v15, %v1639_v42 }
  0x3d   : > { %v434_v50 = vrot.slane %v406_v27, 7  ;;  %v395_v51 = vmul.f32 %v1482_v16, %v1689_v38  ;;  %v483_v53 = vmul.f32 %v1484_v17, %v1586_v43  ;;  %v484_v54 = vmul.f32 %v1484_v17, %v1616_v6 }
  0x3e   : > { %611 = vst.msk [vmem:[%s1548_s30 + $0x30] sm:$0xff] %vm604_vm2, %v598_v13  ;;  %v318_v56 = vadd.f32 %v306_v41, %v290_v48  ;;  %v379_v57 = vadd.f32 %v367_v49, %v351_v46  ;;  %v499_v58 = vmul.f32 %v1486_v18, %v1639_v42  ;;  %v500_v59 = vmul.f32 %v1486_v18, %v1663_v61 }
  0x3f   : > { %v435_v60 = vsel %vm423_vm0, %v433_v20, %v434_v50  ;;  %v527_v43 = vmul.f32 %v1506_v30, %v1689_v38  ;;  %v528_v62 = vmul.f32 %v1506_v30, %v1715_v55  ;;  %v263_v63 = vmul.f32 %v1466_v9, %v1616_v6 }
  0x40   : > { %v467_v0 = vadd.f32 %v435_v60, %v335_v47  ;;  %v336_v1 = vadd.f32 %v1513_v32, %v318_v56  ;;  %v407_v2 = vadd.f32 %v395_v51, %v379_v57  ;;  %v511_v52 = vadd.f32 %v499_v58, %v483_v53  ;;  %v1772_v56 = vld [vmem:[%s1461_s25 + $0x68] sm:$0xff] }
  0x41   : > { %v512_v3 = vadd.f32 %v500_v59, %v484_v54  ;;  %v279_v4 = vmul.f32 %v1468_v10, %v1663_v61  ;;  %v307_v5 = vmul.f32 %v1470_v11, %v1715_v55  ;;  %v352_v7 = vmul.f32 %v1472_v12, %v1616_v6 }
  0x42   : > { %v599_v19 = vadd.f32 %v589_v45, %v467_v0  ;;  %v436_v14 = vrot.slane %v407_v2, 7  ;;  %v539_v20 = vadd.f32 %v527_v43, %v511_v52  ;;  %v368_v22 = vmul.f32 %v1480_v15, %v1663_v61 }
  0x43   : > { %v540_v23 = vadd.f32 %v528_v62, %v512_v3  ;;  %v291_v24 = vadd.f32 %v279_v4, %v263_v63  ;;  %v396_v25 = vmul.f32 %v1482_v16, %v1715_v55  ;;  %v264_v26 = vmul.f32 %v1466_v9, %v1639_v42 }
  0x44   : > { %612 = vst.msk [vmem:[%s1548_s30 + $0x38] sm:$0xff] %vm604_vm2, %v599_v19  ;;  %v458_v8 = vsel %vm423_vm0, 0.0, %v436_v14  ;;  %v568_v28 = vrot.slane %v539_v20, 1  ;;  %v380_v6 = vadd.f32 %v368_v22, %v352_v7  ;;  %v280_v31 = vmul.f32 %v1468_v10, %v1689_v38 }
  0x45   : > { %v468_v33 = vadd.f32 %v458_v8, %v336_v1  ;;  %v569_v34 = vrot.slane %v540_v23, 1  ;;  %v319_v35 = vadd.f32 %v307_v5, %v291_v24  ;;  %v308_v36 = vmul.f32 %v1470_v11, %v1745_v29 }
  0x46   : > { %v408_v37 = vadd.f32 %v396_v25, %v380_v6  ;;  %v292_v39 = vadd.f32 %v280_v31, %v264_v26  ;;  %v353_v21 = vmul.f32 %v1472_v12, %v1639_v42  ;;  %v369_v40 = vmul.f32 %v1480_v15, %v1689_v38  ;;  %v1795_v25 = vld [vmem:[%s1461_s25 + $0x70] sm:$0xff] }
  0x47   : > { %v570_v41 = vsel %vm555_vm1, %v568_v28, %v569_v34  ;;  %v337_v44 = vadd.f32 %v1513_v32, %v319_v35  ;;  %v590_v27 = vsel %vm555_vm1, %v569_v34, 0.0  ;;  %v397_v45 = vmul.f32 %v1482_v16, %v1745_v29 }
  0x48   : > { %v600_v46 = vadd.f32 %v570_v41, %v468_v33  ;;  %v437_v13 = vrot.slane %v408_v37, 7  ;;  %v320_v47 = vadd.f32 %v308_v36, %v292_v39  ;;  %v381_v48 = vadd.f32 %v369_v40, %v353_v21 }
  0x49   : > { %v485_v49 = vmul.f32 %v1484_v17, %v1639_v42  ;;  %v486_v50 = vmul.f32 %v1484_v17, %v1663_v61  ;;  %v501_v51 = vmul.f32 %v1486_v18, %v1689_v38  ;;  %v502_v53 = vmul.f32 %v1486_v18, %v1715_v55 }
  0x4a   : > { %613 = vst.msk [vmem:[%s1548_s30 + $0x40] sm:$0xff] %vm604_vm2, %v600_v46  ;;  %v438_v54 = vsel %vm423_vm0, %v436_v14, %v437_v13  ;;  %v338_v57 = vadd.f32 %v1513_v32, %v320_v47  ;;  %v409_v58 = vadd.f32 %v397_v45, %v381_v48  ;;  %v529_v42 = vmul.f32 %v1506_v30, %v1745_v29  ;;  %v1819_v46 = vld [vmem:[%s1461_s25 + $0x78] sm:$0xff] }
  0x4b   : > { %v469_v59 = vadd.f32 %v438_v54, %v337_v44  ;;  %v513_v60 = vadd.f32 %v501_v51, %v485_v49  ;;  %v514_v43 = vadd.f32 %v502_v53, %v486_v50  ;;  %v530_v62 = vmul.f32 %v1506_v30, %v1772_v56 }
  0x4c   : > { %v439_v63 = vrot.slane %v409_v58, 7  ;;  %v265_v0 = vmul.f32 %v1466_v9, %v1663_v61  ;;  %v281_v1 = vmul.f32 %v1468_v10, %v1715_v55  ;;  %v309_v2 = vmul.f32 %v1470_v11, %v1772_v56 }
  0x4d   : > { %v601_v52 = vadd.f32 %v590_v27, %v469_v59  ;;  %v541_v3 = vadd.f32 %v529_v42, %v513_v60  ;;  %v542_v4 = vadd.f32 %v530_v62, %v514_v43  ;;  %v354_v5 = vmul.f32 %v1472_v12, %v1663_v61 }
  0x4e   : > { %v459_v7 = vsel %vm423_vm0, 0.0, %v439_v63  ;;  %v293_v19 = vadd.f32 %v281_v1, %v265_v0  ;;  %v370_v14 = vmul.f32 %v1480_v15, %v1715_v55  ;;  %v398_v20 = vmul.f32 %v1482_v16, %v1772_v56 }
  0x4f   : > { %614 = vst.msk [vmem:[%s1548_s30 + $0x48] sm:$0xff] %vm604_vm2, %v601_v52  ;;  %v470_v22 = vadd.f32 %v459_v7, %v338_v57  ;;  %v571_v23 = vrot.slane %v541_v3, 1  ;;  %v572_v24 = vrot.slane %v542_v4, 1  ;;  %v634_v26 = vmul.f32 %v1466_v9, %v1689_v38 }
  0x50   : > { %v321_v61 = vadd.f32 %v309_v2, %v293_v19  ;;  %v382_v8 = vadd.f32 %v370_v14, %v354_v5  ;;  %v646_v28 = vmul.f32 %v1468_v10, %v1745_v29  ;;  %v670_v6 = vmul.f32 %v1795_v25, %v1470_v11 }
  0x51   : > { %v573_v31 = vsel %vm555_vm1, %v571_v23, %v572_v24  ;;  %v591_v33 = vsel %vm555_vm1, %v572_v24, 0.0  ;;  %v706_v34 = vmul.f32 %v1472_v12, %v1689_v38  ;;  %v718_v35 = vmul.f32 %v1480_v15, %v1745_v29 }
  0x52   : > { %v602_v36 = vadd.f32 %v573_v31, %v470_v22  ;;  %v339_v37 = vadd.f32 %v1513_v32, %v321_v61  ;;  %v410_v39 = vadd.f32 %v398_v20, %v382_v8  ;;  %v658_v21 = vadd.f32 %v646_v28, %v634_v26  ;;  %v1845_v20 = vld [vmem:[%s1461_s25 + $0x80] sm:$0xff] }
  0x53   : > { %v730_v40 = vadd.f32 %v718_v35, %v706_v34  ;;  %v742_v41 = vmul.f32 %v1795_v25, %v1482_v16  ;;  %v826_v44 = vmul.f32 %v1484_v17, %v1689_v38  ;;  %v827_v27 = vmul.f32 %v1484_v17, %v1715_v55 }
  0x54   : > { %615 = vst.msk [vmem:[%s1548_s30 + $0x50] sm:$0xff] %vm604_vm2, %v602_v36  ;;  %v440_v45 = vrot.slane %v410_v39, 7  ;;  %v682_v13 = vadd.f32 %v670_v6, %v658_v21  ;;  %v838_v47 = vmul.f32 %v1486_v18, %v1745_v29  ;;  %v839_v48 = vmul.f32 %v1486_v18, %v1772_v56  ;;  %v1871_v21 = vld [vmem:[%s1461_s25 + $0x88] sm:$0xff] }
  0x55   : > { %v754_v49 = vadd.f32 %v742_v41, %v730_v40  ;;  %v862_v50 = vmul.f32 %v1795_v25, %v1506_v30  ;;  %v863_v38 = vmul.f32 %v1819_v46, %v1506_v30  ;;  %v635_v51 = vmul.f32 %v1466_v9, %v1715_v55 }
  0x56   : > { %v441_v53 = vsel %vm423_vm0, %v439_v63, %v440_v45  ;;  %v694_v54 = vadd.f32 %v1513_v32, %v682_v13  ;;  %v850_v57 = vadd.f32 %v838_v47, %v826_v44  ;;  %v851_v58 = vadd.f32 %v839_v48, %v827_v27 }
  0x57   : > { %v471_v42 = vadd.f32 %v441_v53, %v339_v37  ;;  %v778_v59 = vrot.slane %v754_v49, 7  ;;  %v647_v60 = vmul.f32 %v1468_v10, %v1772_v56  ;;  %v671_v43 = vmul.f32 %v1819_v46, %v1470_v11 }
  0x58   : > { %v874_v62 = vadd.f32 %v862_v50, %v850_v57  ;;  %v875_v0 = vadd.f32 %v863_v38, %v851_v58  ;;  %v707_v1 = vmul.f32 %v1472_v12, %v1715_v55  ;;  %v719_v63 = vmul.f32 %v1480_v15, %v1772_v56 }
  0x59   : > { %v603_v2 = vadd.f32 %v591_v33, %v471_v42  ;;  %v808_v52 = vsel %vm423_vm0, 0.0, %v778_v59  ;;  %v659_v3 = vadd.f32 %v647_v60, %v635_v51  ;;  %v743_v4 = vmul.f32 %v1819_v46, %v1482_v16 }
  0x5a   : > { %v814_v5 = vadd.f32 %v808_v52, %v694_v54  ;;  %v898_v7 = vrot.slane %v874_v62, 1  ;;  %v899_v19 = vrot.slane %v875_v0, 1  ;;  %v731_v14 = vadd.f32 %v719_v63, %v707_v1  ;;  %v1901_v52 = vld [vmem:[%s1461_s25 + $0x90] sm:$0xff] }
  0x5b   : > { %616 = vst.msk [vmem:[%s1548_s30 + $0x58] sm:$0xff] %vm604_vm2, %v603_v2  ;;  %v683_v22 = vadd.f32 %v671_v43, %v659_v3  ;;  %v636_v55 = vmul.f32 %v1466_v9, %v1745_v29  ;;  %v648_v23 = vmul.f32 %v1795_v25, %v1468_v10  ;;  %v672_v24 = vmul.f32 %v1845_v20, %v1470_v11 }
  0x5c   : > { %v900_v26 = vsel %vm555_vm1, %v898_v7, %v899_v19  ;;  %v755_v61 = vadd.f32 %v743_v4, %v731_v14  ;;  %v928_v8 = vsel %vm555_vm1, %v899_v19, 0.0  ;;  %v708_v28 = vmul.f32 %v1472_v12, %v1745_v29 }
  0x5d   : > { %v934_v6 = vadd.f32 %v900_v26, %v814_v5  ;;  %v695_v31 = vadd.f32 %v1513_v32, %v683_v22  ;;  %v660_v33 = vadd.f32 %v648_v23, %v636_v55  ;;  %v720_v34 = vmul.f32 %v1795_v25, %v1480_v15 }
  0x5e   : > { %v779_v35 = vrot.slane %v755_v61, 7  ;;  %v744_v36 = vmul.f32 %v1845_v20, %v1482_v16  ;;  %v828_v37 = vmul.f32 %v1484_v17, %v1745_v29  ;;  %v829_v39 = vmul.f32 %v1484_v17, %v1772_v56 }
  0x5f   : > { %1323 = vst.msk [vmem:[%s1548_s30 + $0x60] sm:$0xff] %vm604_vm2, %v934_v6  ;;  %v684_v40 = vadd.f32 %v672_v24, %v660_v33  ;;  %v732_v41 = vadd.f32 %v720_v34, %v708_v28  ;;  %v840_v44 = vmul.f32 %v1795_v25, %v1486_v18  ;;  %v841_v27 = vmul.f32 %v1819_v46, %v1486_v18 }
  0x60   : > { %v780_v45 = vsel %vm423_vm0, %v778_v59, %v779_v35  ;;  %v864_v29 = vmul.f32 %v1845_v20, %v1506_v30  ;;  %v865_v13 = vmul.f32 %v1871_v21, %v1506_v30  ;;  %v637_v47 = vmul.f32 %v1466_v9, %v1772_v56 }
  0x61   : > { %v815_v48 = vadd.f32 %v780_v45, %v695_v31  ;;  %v696_v49 = vadd.f32 %v1513_v32, %v684_v40  ;;  %v756_v50 = vadd.f32 %v744_v36, %v732_v41  ;;  %v852_v38 = vadd.f32 %v840_v44, %v828_v37  ;;  %v1928_v40 = vld [vmem:[%s1461_s25 + $0x98] sm:$0xff] }
  0x62   : > { %v853_v51 = vadd.f32 %v841_v27, %v829_v39  ;;  %v649_v53 = vmul.f32 %v1819_v46, %v1468_v10  ;;  %v673_v54 = vmul.f32 %v1871_v21, %v1470_v11  ;;  %v709_v57 = vmul.f32 %v1472_v12, %v1772_v56 }
  0x63   : > { %v935_v58 = vadd.f32 %v928_v8, %v815_v48  ;;  %v781_v42 = vrot.slane %v756_v50, 7  ;;  %v876_v59 = vadd.f32 %v864_v29, %v852_v38  ;;  %v721_v60 = vmul.f32 %v1819_v46, %v1480_v15 }
  0x64   : > { %v877_v43 = vadd.f32 %v865_v13, %v853_v51  ;;  %v661_v62 = vadd.f32 %v649_v53, %v637_v47  ;;  %v745_v0 = vmul.f32 %v1871_v21, %v1482_v16  ;;  %v638_v1 = vmul.f32 %v1795_v25, %v1466_v9 }
  0x65   : > { %1324 = vst.msk [vmem:[%s1548_s30 + $0x68] sm:$0xff] %vm604_vm2, %v935_v58  ;;  %v809_v63 = vsel %vm423_vm0, 0.0, %v781_v42  ;;  %v901_v2 = vrot.slane %v876_v59, 1  ;;  %v733_v56 = vadd.f32 %v721_v60, %v709_v57  ;;  %v650_v3 = vmul.f32 %v1845_v20, %v1468_v10 }
  0x66   : > { %v816_v4 = vadd.f32 %v809_v63, %v696_v49  ;;  %v902_v5 = vrot.slane %v877_v43, 1  ;;  %v685_v7 = vadd.f32 %v673_v54, %v661_v62  ;;  %v674_v19 = vmul.f32 %v1901_v52, %v1470_v11 }
  0x67   : > { %v757_v14 = vadd.f32 %v745_v0, %v733_v56  ;;  %v662_v22 = vadd.f32 %v650_v3, %v638_v1  ;;  %v710_v55 = vmul.f32 %v1795_v25, %v1472_v12  ;;  %v722_v23 = vmul.f32 %v1845_v20, %v1480_v15  ;;  %v1951_v0 = vld [vmem:[%s1461_s25 + $0xa0] sm:$0xff] }
  0x68   : > { %v903_v24 = vsel %vm555_vm1, %v901_v2, %v902_v5  ;;  %v697_v26 = vadd.f32 %v1513_v32, %v685_v7  ;;  %v929_v61 = vsel %vm555_vm1, %v902_v5, 0.0  ;;  %v746_v8 = vmul.f32 %v1901_v52, %v1482_v16 }
  0x69   : > { %v936_v28 = vadd.f32 %v903_v24, %v816_v4  ;;  %v782_v6 = vrot.slane %v757_v14, 7  ;;  %v686_v31 = vadd.f32 %v674_v19, %v662_v22  ;;  %v734_v33 = vadd.f32 %v722_v23, %v710_v55 }
  0x6a   : > { %v830_v34 = vmul.f32 %v1795_v25, %v1484_v17  ;;  %v831_v35 = vmul.f32 %v1819_v46, %v1484_v17  ;;  %v842_v36 = vmul.f32 %v1845_v20, %v1486_v18  ;;  %v843_v37 = vmul.f32 %v1871_v21, %v1486_v18 }
  0x6b   : > { %1325 = vst.msk [vmem:[%s1548_s30 + $0x70] sm:$0xff] %vm604_vm2, %v936_v28  ;;  %v783_v39 = vsel %vm423_vm0, %v781_v42, %v782_v6  ;;  %v698_v41 = vadd.f32 %v1513_v32, %v686_v31  ;;  %v758_v44 = vadd.f32 %v746_v8, %v734_v33  ;;  %v866_v25 = vmul.f32 %v1901_v52, %v1506_v30  ;;  %v1975_v28 = vld [vmem:[%s1461_s25 + $0xa8] sm:$0xff] }
  0x6c   : > { %v817_v27 = vadd.f32 %v783_v39, %v697_v26  ;;  %v854_v45 = vadd.f32 %v842_v36, %v830_v34  ;;  %v855_v29 = vadd.f32 %v843_v37, %v831_v35  ;;  %v867_v13 = vmul.f32 %v1928_v40, %v1506_v30 }
  0x6d   : > { %v784_v47 = vrot.slane %v758_v44, 7  ;;  %v639_v48 = vmul.f32 %v1819_v46, %v1466_v9  ;;  %v651_v49 = vmul.f32 %v1871_v21, %v1468_v10  ;;  %v675_v50 = vmul.f32 %v1928_v40, %v1470_v11 }
  0x6e   : > { %v937_v38 = vadd.f32 %v929_v61, %v817_v27  ;;  %v878_v51 = vadd.f32 %v866_v25, %v854_v45  ;;  %v879_v53 = vadd.f32 %v867_v13, %v855_v29  ;;  %v711_v54 = vmul.f32 %v1819_v46, %v1472_v12 }
  0x6f   : > { %v810_v57 = vsel %vm423_vm0, 0.0, %v784_v47  ;;  %v663_v58 = vadd.f32 %v651_v49, %v639_v48  ;;  %v723_v42 = vmul.f32 %v1871_v21, %v1480_v15  ;;  %v747_v59 = vmul.f32 %v1928_v40, %v1482_v16 }
  0x70   : > { %1326 = vst.msk [vmem:[%s1548_s30 + $0x78] sm:$0xff] %vm604_vm2, %v937_v38  ;;  %v818_v60 = vadd.f32 %v810_v57, %v698_v41  ;;  %v904_v43 = vrot.slane %v878_v51, 1  ;;  %v905_v62 = vrot.slane %v879_v53, 1  ;;  %v640_v1 = vmul.f32 %v1845_v20, %v1466_v9 }
  0x71   : > { %v687_v46 = vadd.f32 %v675_v50, %v663_v58  ;;  %v735_v63 = vadd.f32 %v723_v42, %v711_v54  ;;  %v652_v2 = vmul.f32 %v1901_v52, %v1468_v10  ;;  %v676_v56 = vmul.f32 %v1951_v0, %v1470_v11 }
  0x72   : > { %v906_v3 = vsel %vm555_vm1, %v904_v43, %v905_v62  ;;  %v930_v4 = vsel %vm555_vm1, %v905_v62, 0.0  ;;  %v712_v5 = vmul.f32 %v1845_v20, %v1472_v12  ;;  %v724_v7 = vmul.f32 %v1901_v52, %v1480_v15 }
  0x73   : > { %v938_v19 = vadd.f32 %v906_v3, %v818_v60  ;;  %v699_v14 = vadd.f32 %v1513_v32, %v687_v46  ;;  %v759_v22 = vadd.f32 %v747_v59, %v735_v63  ;;  %v664_v55 = vadd.f32 %v652_v2, %v640_v1  ;;  %v2001_v59 = vld [vmem:[%s1461_s25 + $0xb0] sm:$0xff] }
  0x74   : > { %v736_v23 = vadd.f32 %v724_v7, %v712_v5  ;;  %v748_v24 = vmul.f32 %v1951_v0, %v1482_v16  ;;  %v832_v26 = vmul.f32 %v1845_v20, %v1484_v17  ;;  %v833_v61 = vmul.f32 %v1871_v21, %v1484_v17 }
  0x75   : > { %1327 = vst.msk [vmem:[%s1548_s30 + $0x80] sm:$0xff] %vm604_vm2, %v938_v19  ;;  %v785_v8 = vrot.slane %v759_v22, 7  ;;  %v688_v6 = vadd.f32 %v676_v56, %v664_v55  ;;  %v844_v31 = vmul.f32 %v1901_v52, %v1486_v18  ;;  %v845_v33 = vmul.f32 %v1928_v40, %v1486_v18  ;;  %v2027_v55 = vld [vmem:[%s1461_s25 + $0xb8] sm:$0xff] }
  0x76   : > { %v760_v34 = vadd.f32 %v748_v24, %v736_v23  ;;  %v868_v35 = vmul.f32 %v1951_v0, %v1506_v30  ;;  %v869_v20 = vmul.f32 %v1975_v28, %v1506_v30  ;;  %v641_v36 = vmul.f32 %v1871_v21, %v1466_v9 }
  0x77   : > { %v786_v37 = vsel %vm423_vm0, %v784_v47, %v785_v8  ;;  %v700_v39 = vadd.f32 %v1513_v32, %v688_v6  ;;  %v856_v41 = vadd.f32 %v844_v31, %v832_v26  ;;  %v857_v44 = vadd.f32 %v845_v33, %v833_v61 }
  0x78   : > { %v819_v25 = vadd.f32 %v786_v37, %v699_v14  ;;  %v787_v27 = vrot.slane %v760_v34, 7  ;;  %v653_v45 = vmul.f32 %v1928_v40, %v1468_v10  ;;  %v677_v29 = vmul.f32 %v1975_v28, %v1470_v11 }
  0x79   : > { %v880_v13 = vadd.f32 %v868_v35, %v856_v41  ;;  %v881_v48 = vadd.f32 %v869_v20, %v857_v44  ;;  %v713_v49 = vmul.f32 %v1871_v21, %v1472_v12  ;;  %v725_v47 = vmul.f32 %v1928_v40, %v1480_v15 }
  0x7a   : > { %v939_v50 = vadd.f32 %v930_v4, %v819_v25  ;;  %v811_v38 = vsel %vm423_vm0, 0.0, %v787_v27  ;;  %v665_v51 = vadd.f32 %v653_v45, %v641_v36  ;;  %v749_v53 = vmul.f32 %v1975_v28, %v1482_v16 }
  0x7b   : > { %v820_v54 = vadd.f32 %v811_v38, %v700_v39  ;;  %v907_v57 = vrot.slane %v880_v13, 1  ;;  %v908_v58 = vrot.slane %v881_v48, 1  ;;  %v737_v42 = vadd.f32 %v725_v47, %v713_v49 }
  0x7c   : > { %1328 = vst.msk [vmem:[%s1548_s30 + $0x88] sm:$0xff] %vm604_vm2, %v939_v50  ;;  %v689_v60 = vadd.f32 %v677_v29, %v665_v51  ;;  %v642_v21 = vmul.f32 %v1901_v52, %v1466_v9  ;;  %v654_v43 = vmul.f32 %v1951_v0, %v1468_v10  ;;  %v678_v62 = vmul.f32 %v2001_v59, %v1470_v11  ;;  %v2057_v50 = vld [vmem:[%s1461_s25 + $0xc0] sm:$0xff] }
  0x7d   : > { %v909_v1 = vsel %vm555_vm1, %v907_v57, %v908_v58  ;;  %v761_v46 = vadd.f32 %v749_v53, %v737_v42  ;;  %v931_v63 = vsel %vm555_vm1, %v908_v58, 0.0  ;;  %v714_v2 = vmul.f32 %v1901_v52, %v1472_v12 }
  0x7e   : > { %v940_v56 = vadd.f32 %v909_v1, %v820_v54  ;;  %v701_v3 = vadd.f32 %v1513_v32, %v689_v60  ;;  %v666_v4 = vadd.f32 %v654_v43, %v642_v21  ;;  %v726_v5 = vmul.f32 %v1951_v0, %v1480_v15 }
  0x7f   : > { %v788_v7 = vrot.slane %v761_v46, 7  ;;  %v750_v19 = vmul.f32 %v2001_v59, %v1482_v16  ;;  %v834_v14 = vmul.f32 %v1901_v52, %v1484_v17  ;;  %v835_v22 = vmul.f32 %v1928_v40, %v1484_v17 }
  0x80   : > { %1329 = vst.msk [vmem:[%s1548_s30 + $0x90] sm:$0xff] %vm604_vm2, %v940_v56  ;;  %v690_v23 = vadd.f32 %v678_v62, %v666_v4  ;;  %v738_v24 = vadd.f32 %v726_v5, %v714_v2  ;;  %v846_v26 = vmul.f32 %v1951_v0, %v1486_v18  ;;  %v847_v61 = vmul.f32 %v1975_v28, %v1486_v18  ;;  %v2071_v62 = vld [vmem:[%s2315_s2] ss:$0 sm:$0xff] }
  0x81   : > { %v789_v8 = vsel %vm423_vm0, %v787_v27, %v788_v7  ;;  %v870_v52 = vmul.f32 %v2001_v59, %v1506_v30  ;;  %v871_v6 = vmul.f32 %v2027_v55, %v1506_v30  ;;  %v643_v31 = vmul.f32 %v1928_v40, %v1466_v9 }
  0x82   : > { %v821_v33 = vadd.f32 %v789_v8, %v701_v3  ;;  %v702_v34 = vadd.f32 %v1513_v32, %v690_v23  ;;  %v762_v35 = vadd.f32 %v750_v19, %v738_v24  ;;  %v858_v20 = vadd.f32 %v846_v26, %v834_v14  ;;  %v2089_v23 = vld [vmem:[%s1461_s25 + $0xc8] sm:$0xff] }
  0x83   : > { %v859_v36 = vadd.f32 %v847_v61, %v835_v22  ;;  %v655_v37 = vmul.f32 %v1975_v28, %v1468_v10  ;;  %v679_v39 = vmul.f32 %v2027_v55, %v1470_v11  ;;  %v715_v41 = vmul.f32 %v1928_v40, %v1472_v12 }
  0x84   : > { %v941_v44 = vadd.f32 %v931_v63, %v821_v33  ;;  %v790_v25 = vrot.slane %v762_v35, 7  ;;  %v882_v27 = vadd.f32 %v870_v52, %v858_v20  ;;  %v727_v45 = vmul.f32 %v1975_v28, %v1480_v15 }
  0x85   : > { %v883_v32 = vadd.f32 %v871_v6, %v859_v36  ;;  %v667_v29 = vadd.f32 %v655_v37, %v643_v31  ;;  %v751_v13 = vmul.f32 %v2027_v55, %v1482_v16  ;;  %v644_v48 = vmul.f32 %v1951_v0, %v1466_v9 }
  0x86   : > { %1330 = vst.msk [vmem:[%s1548_s30 + $0x98] sm:$0xff] %vm604_vm2, %v941_v44  ;;  %v812_v49 = vsel %vm423_vm0, 0.0, %v790_v25  ;;  %v910_v47 = vrot.slane %v882_v27, 1  ;;  %v739_v40 = vadd.f32 %v727_v45, %v715_v41  ;;  %v656_v38 = vmul.f32 %v2001_v59, %v1468_v10 }
  0x87   : > { %v822_v51 = vadd.f32 %v812_v49, %v702_v34  ;;  %v911_v53 = vrot.slane %v883_v32, 1  ;;  %v691_v54 = vadd.f32 %v679_v39, %v667_v29  ;;  %v680_v57 = vmul.f32 %v2057_v50, %v1470_v11 }
  0x88   : > { %v763_v58 = vadd.f32 %v751_v13, %v739_v40  ;;  %v668_v42 = vadd.f32 %v656_v38, %v644_v48  ;;  %v716_v60 = vmul.f32 %v1951_v0, %v1472_v12  ;;  %v728_v21 = vmul.f32 %v2001_v59, %v1480_v15  ;;  %v2112_v13 = vld [vmem:[%s1461_s25 + $0xd0] sm:$0xff] }
  0x89   : > { %v912_v43 = vsel %vm555_vm1, %v910_v47, %v911_v53  ;;  %v703_v1 = vadd.f32 %v2071_v62, %v691_v54  ;;  %v932_v46 = vsel %vm555_vm1, %v911_v53, 0.0  ;;  %v752_v63 = vmul.f32 %v2057_v50, %v1482_v16 }
  0x8a   : > { %v942_v2 = vadd.f32 %v912_v43, %v822_v51  ;;  %v791_v56 = vrot.slane %v763_v58, 7  ;;  %v692_v3 = vadd.f32 %v680_v57, %v668_v42  ;;  %v740_v4 = vadd.f32 %v728_v21, %v716_v60 }
  0x8b   : > { %v836_v5 = vmul.f32 %v1951_v0, %v1484_v17  ;;  %v837_v7 = vmul.f32 %v1975_v28, %v1484_v17  ;;  %v848_v19 = vmul.f32 %v2001_v59, %v1486_v18  ;;  %v849_v14 = vmul.f32 %v2027_v55, %v1486_v18 }
  0x8c   : > { %1331 = vst.msk [vmem:[%s1548_s30 + $0xa0] sm:$0xff] %vm604_vm2, %v942_v2  ;;  %v792_v22 = vsel %vm423_vm0, %v790_v25, %v791_v56  ;;  %v704_v24 = vadd.f32 %v2071_v62, %v692_v3  ;;  %v764_v26 = vadd.f32 %v752_v63, %v740_v4  ;;  %v872_v0 = vmul.f32 %v2057_v50, %v1506_v30  ;;  %v2136_v2 = vld [vmem:[%s1461_s25 + $0xd8] sm:$0xff] }
  0x8d   : > { %v823_v61 = vadd.f32 %v792_v22, %v703_v1  ;;  %v860_v8 = vadd.f32 %v848_v19, %v836_v5  ;;  %v861_v52 = vadd.f32 %v849_v14, %v837_v7  ;;  %v873_v6 = vmul.f32 %v2089_v23, %v1506_v30 }
  0x8e   : > { %v793_v31 = vrot.slane %v764_v26, 7  ;;  %v645_v33 = vmul.f32 %v1975_v28, %v1466_v9  ;;  %v657_v34 = vmul.f32 %v2027_v55, %v1468_v10  ;;  %v681_v35 = vmul.f32 %v2089_v23, %v1470_v11 }
  0x8f   : > { %v943_v20 = vadd.f32 %v932_v46, %v823_v61  ;;  %v884_v36 = vadd.f32 %v872_v0, %v860_v8  ;;  %v885_v37 = vadd.f32 %v873_v6, %v861_v52  ;;  %v717_v39 = vmul.f32 %v1975_v28, %v1472_v12 }
  0x90   : > { %v813_v41 = vsel %vm423_vm0, 0.0, %v793_v31  ;;  %v669_v44 = vadd.f32 %v657_v34, %v645_v33  ;;  %v729_v25 = vmul.f32 %v2027_v55, %v1480_v15  ;;  %v753_v27 = vmul.f32 %v2089_v23, %v1482_v16 }
  0x91   : > { %1332 = vst.msk [vmem:[%s1548_s30 + $0xa8] sm:$0xff] %vm604_vm2, %v943_v20  ;;  %v824_v45 = vadd.f32 %v813_v41, %v704_v24  ;;  %v913_v32 = vrot.slane %v884_v36, 1  ;;  %v914_v29 = vrot.slane %v885_v37, 1  ;;  %v970_v48 = vmul.f32 %v2001_v59, %v1466_v9 }
  0x92   : > { %v693_v28 = vadd.f32 %v681_v35, %v669_v44  ;;  %v741_v49 = vadd.f32 %v729_v25, %v717_v39  ;;  %v978_v47 = vmul.f32 %v2057_v50, %v1468_v10  ;;  %v994_v40 = vmul.f32 %v2112_v13, %v1470_v11 }
  0x93   : > { %v915_v38 = vsel %vm555_vm1, %v913_v32, %v914_v29  ;;  %v933_v51 = vsel %vm555_vm1, %v914_v29, 0.0  ;;  %v1017_v53 = vmul.f32 %v2001_v59, %v1472_v12  ;;  %v1025_v54 = vmul.f32 %v2057_v50, %v1480_v15 }
  0x94   : > { %v944_v57 = vadd.f32 %v915_v38, %v824_v45  ;;  %v705_v58 = vadd.f32 %v2071_v62, %v693_v28  ;;  %v765_v42 = vadd.f32 %v753_v27, %v741_v49  ;;  %v986_v60 = vadd.f32 %v978_v47, %v970_v48  ;;  %v2162_v27 = vld [vmem:[%s1461_s25 + $0xe0] sm:$0xff] }
  0x95   : > { %v1033_v21 = vadd.f32 %v1025_v54, %v1017_v53  ;;  %v1041_v43 = vmul.f32 %v2112_v13, %v1482_v16  ;;  %v1096_v1 = vmul.f32 %v2001_v59, %v1484_v17  ;;  %v1097_v46 = vmul.f32 %v2027_v55, %v1484_v17 }
  0x96   : > { %1333 = vst.msk [vmem:[%s1548_s30 + $0xb0] sm:$0xff] %vm604_vm2, %v944_v57  ;;  %v794_v63 = vrot.slane %v765_v42, 7  ;;  %v1001_v56 = vadd.f32 %v994_v40, %v986_v60  ;;  %v1104_v3 = vmul.f32 %v2057_v50, %v1486_v18  ;;  %v1105_v4 = vmul.f32 %v2089_v23, %v1486_v18  ;;  %v2188_v60 = vld [vmem:[%s1461_s25 + $0xe8] sm:$0xff] }
  0x97   : > { %v1048_v5 = vadd.f32 %v1041_v43, %v1033_v21  ;;  %v1120_v7 = vmul.f32 %v2112_v13, %v1506_v30  ;;  %v1121_v59 = vmul.f32 %v2136_v2, %v1506_v30  ;;  %v971_v19 = vmul.f32 %v2027_v55, %v1466_v9 }
  0x98   : > { %v795_v14 = vsel %vm423_vm0, %v793_v31, %v794_v63  ;;  %v1009_v22 = vadd.f32 %v2071_v62, %v1001_v56  ;;  %v1112_v24 = vadd.f32 %v1104_v3, %v1096_v1  ;;  %v1113_v26 = vadd.f32 %v1105_v4, %v1097_v46 }
  0x99   : > { %v825_v0 = vadd.f32 %v795_v14, %v705_v58  ;;  %v1064_v61 = vrot.slane %v1048_v5, 7  ;;  %v979_v8 = vmul.f32 %v2089_v23, %v1468_v10  ;;  %v995_v52 = vmul.f32 %v2136_v2, %v1470_v11 }
  0x9a   : > { %v1127_v6 = vadd.f32 %v1120_v7, %v1112_v24  ;;  %v1128_v33 = vadd.f32 %v1121_v59, %v1113_v26  ;;  %v1018_v34 = vmul.f32 %v2027_v55, %v1472_v12  ;;  %v1026_v31 = vmul.f32 %v2089_v23, %v1480_v15 }
  0x9b   : > { %v945_v35 = vadd.f32 %v933_v51, %v825_v0  ;;  %v1084_v20 = vsel %vm423_vm0, 0.0, %v1064_v61  ;;  %v987_v36 = vadd.f32 %v979_v8, %v971_v19  ;;  %v1042_v37 = vmul.f32 %v2136_v2, %v1482_v16 }
  0x9c   : > { %v1088_v39 = vadd.f32 %v1084_v20, %v1009_v22  ;;  %v1143_v41 = vrot.slane %v1127_v6, 1  ;;  %v1144_v44 = vrot.slane %v1128_v33, 1  ;;  %v1034_v25 = vadd.f32 %v1026_v31, %v1018_v34  ;;  %v2218_v20 = vld [vmem:[%s1461_s25 + $0xf0] sm:$0xff] }
  0x9d   : > { %1334 = vst.msk [vmem:[%s1548_s30 + $0xb8] sm:$0xff] %vm604_vm2, %v945_v35  ;;  %v1002_v45 = vadd.f32 %v995_v52, %v987_v36  ;;  %v972_v55 = vmul.f32 %v2057_v50, %v1466_v9  ;;  %v980_v32 = vmul.f32 %v2112_v13, %v1468_v10  ;;  %v996_v29 = vmul.f32 %v2162_v27, %v1470_v11 }
  0x9e   : > { %v1145_v48 = vsel %vm555_vm1, %v1143_v41, %v1144_v44  ;;  %v1049_v28 = vadd.f32 %v1042_v37, %v1034_v25  ;;  %v1163_v49 = vsel %vm555_vm1, %v1144_v44, 0.0  ;;  %v1019_v47 = vmul.f32 %v2057_v50, %v1472_v12 }
  0x9f   : > { %v1167_v40 = vadd.f32 %v1145_v48, %v1088_v39  ;;  %v1010_v38 = vadd.f32 %v2071_v62, %v1002_v45  ;;  %v988_v51 = vadd.f32 %v980_v32, %v972_v55  ;;  %v1027_v53 = vmul.f32 %v2112_v13, %v1480_v15 }
  0xa0   : > { %v1065_v54 = vrot.slane %v1049_v28, 7  ;;  %v1043_v57 = vmul.f32 %v2162_v27, %v1482_v16  ;;  %v1098_v58 = vmul.f32 %v2057_v50, %v1484_v17  ;;  %v1099_v42 = vmul.f32 %v2089_v23, %v1484_v17 }
  0xa1   : > { %1345 = vst.msk [vmem:[%s1548_s30 + $0xc0] sm:$0xff] %vm604_vm2, %v1167_v40  ;;  %v1003_v21 = vadd.f32 %v996_v29, %v988_v51  ;;  %v1035_v43 = vadd.f32 %v1027_v53, %v1019_v47  ;;  %v1106_v1 = vmul.f32 %v2112_v13, %v1486_v18  ;;  %v1107_v46 = vmul.f32 %v2136_v2, %v1486_v18 }
  0xa2   : > { %v1066_v63 = vsel %vm423_vm0, %v1064_v61, %v1065_v54  ;;  %v1122_v50 = vmul.f32 %v2162_v27, %v1506_v30  ;;  %v1123_v56 = vmul.f32 %v2188_v60, %v1506_v30  ;;  %v973_v3 = vmul.f32 %v2089_v23, %v1466_v9 }
  0xa3   : > { %v1089_v4 = vadd.f32 %v1066_v63, %v1010_v38  ;;  %v1011_v5 = vadd.f32 %v2071_v62, %v1003_v21  ;;  %v1050_v7 = vadd.f32 %v1043_v57, %v1035_v43  ;;  %v1114_v59 = vadd.f32 %v1106_v1, %v1098_v58  ;;  %v1344_v21 = vld [vmem:[%s1461_s25 + $0xf8] sm:$0xff] }
  0xa4   : > { %v1115_v19 = vadd.f32 %v1107_v46, %v1099_v42  ;;  %v981_v14 = vmul.f32 %v2136_v2, %v1468_v10  ;;  %v997_v22 = vmul.f32 %v2188_v60, %v1470_v11  ;;  %v1020_v24 = vmul.f32 %v2089_v23, %v1472_v12 }
  0xa5   : > { %v1168_v26 = vadd.f32 %v1163_v49, %v1089_v4  ;;  %v1067_v0 = vrot.slane %v1050_v7, 7  ;;  %v1129_v61 = vadd.f32 %v1122_v50, %v1114_v59  ;;  %v1028_v8 = vmul.f32 %v2136_v2, %v1480_v15 }
  0xa6   : > { %v1130_v52 = vadd.f32 %v1123_v56, %v1115_v19  ;;  %v989_v6 = vadd.f32 %v981_v14, %v973_v3  ;;  %v1044_v33 = vmul.f32 %v2188_v60, %v1482_v16  ;;  %v974_v34 = vmul.f32 %v2112_v13, %v1466_v9 }
  0xa7   : > { %1346 = vst.msk [vmem:[%s1548_s30 + $0xc8] sm:$0xff] %vm604_vm2, %v1168_v26  ;;  %v1085_v31 = vsel %vm423_vm0, 0.0, %v1067_v0  ;;  %v1146_v35 = vrot.slane %v1129_v61, 1  ;;  %v1036_v23 = vadd.f32 %v1028_v8, %v1020_v24  ;;  %v982_v36 = vmul.f32 %v2162_v27, %v1468_v10 }
  0xa8   : > { %v1090_v37 = vadd.f32 %v1085_v31, %v1011_v5  ;;  %v1147_v39 = vrot.slane %v1130_v52, 1  ;;  %v1004_v41 = vadd.f32 %v997_v22, %v989_v6  ;;  %v998_v44 = vmul.f32 %v2218_v20, %v1470_v11 }
  0xa9   : > { %v1051_v25 = vadd.f32 %v1044_v33, %v1036_v23  ;;  %v990_v45 = vadd.f32 %v982_v36, %v974_v34  ;;  %v1021_v55 = vmul.f32 %v2112_v13, %v1472_v12  ;;  %v1029_v32 = vmul.f32 %v2162_v27, %v1480_v15 }
  0xaa   : > { %v1148_v29 = vsel %vm555_vm1, %v1146_v35, %v1147_v39  ;;  %v1012_v48 = vadd.f32 %v2071_v62, %v1004_v41  ;;  %v1164_v28 = vsel %vm555_vm1, %v1147_v39, 0.0  ;;  %v1045_v49 = vmul.f32 %v2218_v20, %v1482_v16 }
  0xab   : > { %v1169_v47 = vadd.f32 %v1148_v29, %v1090_v37  ;;  %v1068_v40 = vrot.slane %v1051_v25, 7  ;;  %v1005_v38 = vadd.f32 %v998_v44, %v990_v45  ;;  %v1037_v51 = vadd.f32 %v1029_v32, %v1021_v55 }
  0xac   : > { %v1100_v53 = vmul.f32 %v2112_v13, %v1484_v17  ;;  %v1101_v54 = vmul.f32 %v2136_v2, %v1484_v17  ;;  %v1108_v57 = vmul.f32 %v2162_v27, %v1486_v18  ;;  %v1109_v58 = vmul.f32 %v2188_v60, %v1486_v18 }
  0xad   : > { %1347 = vst.msk [vmem:[%s1548_s30 + $0xd0] sm:$0xff] %vm604_vm2, %v1169_v47  ;;  %v1069_v42 = vsel %vm423_vm0, %v1067_v0, %v1068_v40  ;;  %v1013_v43 = vadd.f32 %v2071_v62, %v1005_v38  ;;  %v1052_v1 = vadd.f32 %v1045_v49, %v1037_v51  ;;  %v1124_v13 = vmul.f32 %v2218_v20, %v1506_v30 }
  0xae   : > { %v1091_v46 = vadd.f32 %v1069_v42, %v1012_v48  ;;  %v1116_v63 = vadd.f32 %v1108_v57, %v1100_v53  ;;  %v1117_v50 = vadd.f32 %v1109_v58, %v1101_v54  ;;  %v1125_v56 = vmul.f32 %v1344_v21, %v1506_v30 }
  0xaf   : > { %v1070_v3 = vrot.slane %v1052_v1, 7  ;;  %v975_v4 = vmul.f32 %v2136_v2, %v1466_v9  ;;  %v983_v5 = vmul.f32 %v2188_v60, %v1468_v10  ;;  %v999_v7 = vmul.f32 %v1344_v21, %v1470_v11 }
  0xb0   : > { %v1170_v59 = vadd.f32 %v1164_v28, %v1091_v46  ;;  %v1131_v19 = vadd.f32 %v1124_v13, %v1116_v63  ;;  %v1132_v14 = vadd.f32 %v1125_v56, %v1117_v50  ;;  %v1022_v22 = vmul.f32 %v2136_v2, %v1472_v12 }
  0xb1   : > { %v1086_v24 = vsel %vm423_vm0, 0.0, %v1070_v3  ;;  %v991_v26 = vadd.f32 %v983_v5, %v975_v4  ;;  %v1030_v0 = vmul.f32 %v2188_v60, %v1480_v15  ;;  %v1046_v61 = vmul.f32 %v1344_v21, %v1482_v16 }
  0xb2   : > { %1348 = vst.msk [vmem:[%s1548_s30 + $0xd8] sm:$0xff] %vm604_vm2, %v1170_v59  ;;  %v1092_v8 = vadd.f32 %v1086_v24, %v1013_v43  ;;  %v1149_v52 = vrot.slane %v1131_v19, 1  ;;  %v1150_v6 = vrot.slane %v1132_v14, 1  ;;  %v976_v33 = vmul.f32 %v2162_v27, %v1466_v9 }
  0xb3   : > { %v1006_v34 = vadd.f32 %v999_v7, %v991_v26  ;;  %v1038_v31 = vadd.f32 %v1030_v0, %v1022_v22  ;;  %v984_v2 = vmul.f32 %v2218_v20, %v1468_v10  ;;  %v1000_v35 = vmul.f32 0.0, %v1470_v11 }
  0xb4   : > { %v1151_v23 = vsel %vm555_vm1, %v1149_v52, %v1150_v6  ;;  %v1165_v36 = vsel %vm555_vm1, %v1150_v6, 0.0  ;;  %v1023_v37 = vmul.f32 %v2162_v27, %v1472_v12  ;;  %v1031_v39 = vmul.f32 %v2218_v20, %v1480_v15 }
  0xb5   : > { %v1171_v41 = vadd.f32 %v1151_v23, %v1092_v8  ;;  %v1014_v44 = vadd.f32 %v2071_v62, %v1006_v34  ;;  %v1053_v25 = vadd.f32 %v1046_v61, %v1038_v31  ;;  %v992_v45 = vadd.f32 %v984_v2, %v976_v33 }
  0xb6   : > { %v1039_v55 = vadd.f32 %v1031_v39, %v1023_v37  ;;  %v1047_v32 = vmul.f32 0.0, %v1482_v16  ;;  %v1102_v11 = vmul.f32 %v2162_v27, %v1484_v17  ;;  %v1103_v29 = vmul.f32 %v2188_v60, %v1484_v17 }
  0xb7   : > { %1349 = vst.msk [vmem:[%s1548_s30 + $0xe0] sm:$0xff] %vm604_vm2, %v1171_v41  ;;  %v1071_v48 = vrot.slane %v1053_v25, 7  ;;  %v1007_v28 = vadd.f32 %v1000_v35, %v992_v45  ;;  %v1110_v49 = vmul.f32 %v2218_v20, %v1486_v18  ;;  %v1111_v47 = vmul.f32 %v1344_v21, %v1486_v18 }
  0xb8   : > { %v1054_v40 = vadd.f32 %v1047_v32, %v1039_v55  ;;  %v1126_v38 = vmul.f32 0.0, %v1506_v30  ;;  %v977_v16 = vmul.f32 %v2188_v60, %v1466_v9  ;;  %v985_v27 = vmul.f32 %v1344_v21, %v1468_v10 }
  0xb9   : > { %v1072_v51 = vsel %vm423_vm0, %v1070_v3, %v1071_v48  ;;  %v1015_v17 = vadd.f32 %v2071_v62, %v1007_v28  ;;  %v1118_v53 = vadd.f32 %v1110_v49, %v1102_v11  ;;  %v1119_v54 = vadd.f32 %v1111_v47, %v1103_v29 }
  0xba   : > { %v1093_v57 = vadd.f32 %v1072_v51, %v1014_v44  ;;  %v1073_v58 = vrot.slane %v1054_v40, 7  ;;  %v993_v20 = vadd.f32 %v985_v27, %v977_v16  ;;  %v1024_v18 = vmul.f32 %v2188_v60, %v1472_v12 }
  0xbb   : > { %v1133_v42 = vadd.f32 %v1126_v38, %v1118_v53  ;;  %v1134_v30 = vadd.f32 %v1126_v38, %v1119_v54  ;;  %v1032_v9 = vmul.f32 %v1344_v21, %v1480_v15 }
  0xbc   : > { %v1172_v43 = vadd.f32 %v1165_v36, %v1093_v57  ;;  %v1087_v10 = vsel %vm423_vm0, 0.0, %v1073_v58  ;;  %v1008_v1 = vadd.f32 %v1000_v35, %v993_v20 }
  0xbd   : > { %v1094_v13 = vadd.f32 %v1087_v10, %v1015_v17  ;;  %v1152_v46 = vrot.slane %v1133_v42, 1  ;;  %v1153_v63 = vrot.slane %v1134_v30, 1  ;;  %v1040_v50 = vadd.f32 %v1032_v9, %v1024_v18 }
  0xbe   : > { %1350 = vst.msk [vmem:[%s1548_s30 + $0xe8] sm:$0xff] %vm604_vm2, %v1172_v43  ;;  %v1016_v60 = vadd.f32 %v2071_v62, %v1008_v1 }
  0xbf   : > { %v1154_v56 = vsel %vm555_vm1, %v1152_v46, %v1153_v63  ;;  %v1055_v3 = vadd.f32 %v1047_v32, %v1040_v50  ;;  %v1166_v21 = vsel %vm555_vm1, %v1153_v63, 0.0 }
  0xc0   : > { %v1173_v12 = vadd.f32 %v1154_v56, %v1094_v13 }
  0xc1   : > { %v1074_v4 = vrot.slane %v1055_v3, 7 }
  0xc2   : > { %1351 = vst.msk [vmem:[%s1548_s30 + $0xf0] sm:$0xff] %vm604_vm2, %v1173_v12 }
  0xc3   : > { %v1075_v15 = vsel %vm423_vm0, %v1073_v58, %v1074_v4 }
  0xc4   : > { %v1095_v5 = vadd.f32 %v1075_v15, %v1016_v60 }
  0xc6   : > { %v1174_v7 = vadd.f32 %v1166_v21, %v1095_v5 }
  0xc8   : > { %1352 = vst.msk [vmem:[%s1548_s30 + $0xf8] sm:$0xff] %vm604_vm2, %v1174_v7 }
  0xc9 PF: > { %s13_s14 = sadd.s32 1, %s1404_s14   ;;  %s2317_s12 = smov %s1400_s13 }
  0xca   : > { %p10_p5 = scmp.ge.s32.totalorder %s13_s14, 4   ;;  %s2318_s13 = smov %s2320_s15 }
  0xcc   :  { %12 = sbr.rel (!%p10_p5) target bundleno = 2 (0x2), region = 72 }

</bundles_post_ra>
